<compile_context>
chip_gen: v7x
topology: tpu7x:2x2x1
jax: 0.10.0
libtpu: 0.0.40
codegen_flags: <defaults>
</compile_context>

<pallas_src>
import functools

import jax
import jax.numpy as jnp
from jax.experimental import pallas as pl
from jax.experimental.pallas import tpu as pltpu

EPS = 1e-5
LANE = 128
SUBLANE = 8
_PRECISION = jax.lax.Precision.HIGHEST


def _round_up(n, m):
    return ((n + m - 1) // m) * m


def _softplus(x):
    # numerically stable softplus = log(1 + exp(x))
    return jnp.logaddexp(x, 0.0)


def _vmem_capacity_bytes():
    try:
        return int(pltpu.get_tpu_info().vmem_capacity_bytes)
    except Exception:
        return 64 * 1024 * 1024  # conservative fallback (v7x-sized VMEM)


# ---------------------------------------------------------------------------
# Pass 1: batch-tiled MLP + fused heads + per-tile BN statistics
# ---------------------------------------------------------------------------
def _encoder_mlp_kernel(x_ref, w1_ref, b1_ref, w2_ref, b2_ref, wh_ref, bh_ref,
                        z_ref, stats_ref, *, n_rows, block_rows, mask_rows):
    x = x_ref[...]                                                   # (tn, V) f32

    # fc1 + softplus
    h = jnp.dot(x, w1_ref[...], preferred_element_type=jnp.float32,
                precision=_PRECISION) + b1_ref[...]
    h = _softplus(h)

    # fc2 + softplus   (padded H columns see softplus(0)=log2 but hit zero rows)
    h = jnp.dot(h, w2_ref[...], preferred_element_type=jnp.float32,
                precision=_PRECISION) + b2_ref[...]
    h = _softplus(h)

    # dropout: identity at inference
    # TODO(synk): training-mode dropout (stochastic mask) intentionally omitted.

    # fused, lane-packed fcmu|fclv head -> (tn, p) slab
    z = jnp.dot(h, wh_ref[...], preferred_element_type=jnp.float32,
                precision=_PRECISION) + bh_ref[...]
    z_ref[...] = z

    # per-tile column sum / sum-of-squares for the global BatchNorm statistics,
    # with padded batch rows masked out (keeps stats exact without an XLA slice
    # of the whole slab).
    if mask_rows:
        row = (jax.lax.broadcasted_iota(jnp.int32, z.shape, 0)
               + pl.program_id(0) * block_rows)
        z = jnp.where(row < n_rows, z, 0.0)
    s1 = jnp.sum(z, axis=0, keepdims=True)                           # (1, p)
    s2 = jnp.sum(z * z, axis=0, keepdims=True)                       # (1, p)
    stats_ref[...] = jnp.concatenate([s1, s2], axis=0)[None]         # (1, 2, p)


# ---------------------------------------------------------------------------
# Pass 2: batch-tiled BatchNorm normalize + selective exp(0.5*logvar)
# ---------------------------------------------------------------------------
def _encoder_bn_kernel(z_ref, stats_ref, out_ref, *, n_rows, lv_offset):
    inv_n = 1.0 / float(n_rows)
    s = stats_ref[...]                                               # (2, p)
    mean = s[0:1, :] * inv_n
    var = jnp.maximum(s[1:2, :] * inv_n - mean * mean, 0.0)          # biased var
    inv_std = jax.lax.rsqrt(var + EPS)

    bn = (z_ref[...] - mean) * inv_std
    col = jax.lax.broadcasted_iota(jnp.int32, bn.shape, 1)
    # lanes [0, lv_offset)   -> loc columns   (identity)
    # lanes [lv_offset, p)   -> logvar columns (exp(0.5 * .))
    out_ref[...] = jnp.where(col >= lv_offset, jnp.exp(0.5 * bn), bn)


# ---------------------------------------------------------------------------
# One-time parameter preparation (hoisted out of the per-call path)
# ---------------------------------------------------------------------------
def prepare_params(params):
    """Pad H to a multiple of 128 and pack the mu|lv heads lane-densely.

    Padded weight ROWS of w2/wh are zero, so softplus(0)=log2 on padded fc1/fc2
    columns never leaks into the results.
    """
    w1, b1 = params["w1"], params["b1"]
    w2, b2 = params["w2"], params["b2"]
    wmu, bmu = params["wmu"], params["bmu"]
    wlv, blv = params["wlv"], params["blv"]

    v, h = w1.shape
    t = wmu.shape[1]
    hp = _round_up(h, LANE)

    # pack mu|lv into one 128-lane tile when possible (halves head/output width)
    if 2 * t <= LANE:
        lv_off, p = LANE // 2, LANE
    else:
        tp = _round_up(t, LANE)
        lv_off, p = tp, 2 * tp

    f32 = jnp.float32
    w1p = jnp.zeros((v, hp), f32).at[:, :h].set(w1)
    b1p = jnp.zeros((1, hp), f32).at[:, :h].set(b1)
    w2p = jnp.zeros((hp, hp), f32).at[:h, :h].set(w2)
    b2p = jnp.zeros((1, hp), f32).at[:, :h].set(b2)
    whp = (jnp.zeros((hp, p), f32)
           .at[:h, :t].set(wmu)
           .at[:h, lv_off:lv_off + t].set(wlv))
    bhp = (jnp.zeros((1, p), f32)
           .at[:, :t].set(bmu)
           .at[:, lv_off:lv_off + t].set(blv))

    return dict(w1=w1p, b1=b1p, w2=w2p, b2=b2p, wh=whp, bh=bhp,
                num_topics=t, lv_offset=lv_off, head_width=p, hidden_padded=hp)


def _choose_batch_tile(n, v, vmem_cap):
    # f32 x tile, double-buffered; keep the streamed-x budget ~1/4 of VMEM
    # (v5e/v6e: 128 MiB -> large tiles; v7x: 64 MiB -> smaller tiles).
    budget = max(2 * 1024 * 1024, vmem_cap // 4)
    cap_rows = max(SUBLANE, budget // max(1, 2 * 4 * v))
    t = min(1024, cap_rows, _round_up(n, SUBLANE))
    t = max(SUBLANE, (t // SUBLANE) * SUBLANE)
    # v7x megacore: keep >= 2 tiles on the 'parallel' batch axis when possible.
    if n > SUBLANE and _round_up(n, t) // t < 2:
        t = max(SUBLANE, _round_up((n + 1) // 2, SUBLANE))
    return t


# ---------------------------------------------------------------------------
# Wrapper
# ---------------------------------------------------------------------------
def encoder_forward(x, prep):
    """x: (N, V) float32.  prep: output of prepare_params()."""
    x = jnp.asarray(x, jnp.float32)
    n, v = x.shape
    hp = prep["hidden_padded"]
    p = prep["head_width"]
    t = prep["num_topics"]
    lv_off = prep["lv_offset"]

    vmem_cap = _vmem_capacity_bytes()
    vmem_limit = int(vmem_cap * 3 // 4)

    tn = _choose_batch_tile(n, v, vmem_cap)
    n_pad = _round_up(n, tn)
    if n_pad != n:
        x = jnp.pad(x, ((0, n_pad - n), (0, 0)))
    ntiles = n_pad // tn

    # TODO(synk): for very large vocab (f32 W1 > ~1/3 of VMEM, i.e. much sooner
    # on v7x's 64 MiB) add an inner 'arbitrary' K grid axis streaming W1 tiles
    # into a VMEM f32 accumulator, and stream x/W1 as bf16 (or int8 counts on
    # v5e/v6e) with f32 accumulation; single-buffer the constant-index weight
    # operands via pipeline_mode=pl.Buffered(1) to halve resident-weight VMEM.

    mlp_kernel = functools.partial(
        _encoder_mlp_kernel, n_rows=n, block_rows=tn, mask_rows=(n_pad != n))

    z, stats = pl.pallas_call(
        mlp_kernel,
        out_shape=(jax.ShapeDtypeStruct((n_pad, p), jnp.float32),
                   jax.ShapeDtypeStruct((ntiles, 2, p), jnp.float32)),
        grid_spec=pltpu.PrefetchScalarGridSpec(
            num_scalar_prefetch=0,
            grid=(ntiles,),
            in_specs=[
                pl.BlockSpec((tn, v), lambda i: (i, 0)),       # x tile (streamed)
                pl.BlockSpec((v, hp), lambda i: (0, 0)),       # w1 (VMEM-resident)
                pl.BlockSpec((1, hp), lambda i: (0, 0)),       # b1
                pl.BlockSpec((hp, hp), lambda i: (0, 0)),      # w2
                pl.BlockSpec((1, hp), lambda i: (0, 0)),       # b2
                pl.BlockSpec((hp, p), lambda i: (0, 0)),       # fused mu|lv head W
                pl.BlockSpec((1, p), lambda i: (0, 0)),        # fused head b
            ],
            out_specs=(
                pl.BlockSpec((tn, p), lambda i: (i, 0)),       # pre-BN slab tile
                pl.BlockSpec((1, 2, p), lambda i: (i, 0, 0)),  # per-tile sum/sumsq
            ),
        ),
        compiler_params=pltpu.CompilerParams(
            dimension_semantics=("parallel",),
            vmem_limit_bytes=vmem_limit),
    )(x, prep["w1"], prep["b1"], prep["w2"], prep["b2"], prep["wh"], prep["bh"])

    # Tiny cross-tile combine of the per-tile column statistics (ntiles x 2 x p).
    tot = jnp.sum(stats, axis=0)                                   # (2, p) f32

    bn_kernel = functools.partial(_encoder_bn_kernel, n_rows=n, lv_offset=lv_off)

    out = pl.pallas_call(
        bn_kernel,
        out_shape=jax.ShapeDtypeStruct((n_pad, p), jnp.float32),
        grid_spec=pltpu.PrefetchScalarGridSpec(
            num_scalar_prefetch=0,
            grid=(ntiles,),
            in_specs=[
                pl.BlockSpec((tn, p), lambda i: (i, 0)),       # slab tile
                pl.BlockSpec((2, p), lambda i: (0, 0)),        # global stats
            ],
            out_specs=pl.BlockSpec((tn, p), lambda i: (i, 0)),
        ),
        compiler_params=pltpu.CompilerParams(
            dimension_semantics=("parallel",),
            vmem_limit_bytes=vmem_limit),
    )(z, tot)

    loc = out[:n, :t]
    scale = out[:n, lv_off:lv_off + t]
    return loc, scale


# ---------------------------------------------------------------------------
# Parameter init + pure-JAX reference
# ---------------------------------------------------------------------------
def init_params(key, vocab_size, num_topics, hidden):
    """Deterministic synthetic parameter init (PyTorch-Linear-like uniform)."""
    ks = jax.random.split(key, 8)

    def lin(kw, kb, fan_in, fan_out):
        bound = 1.0 / jnp.sqrt(jnp.float32(fan_in))
        w = jax.random.uniform(kw, (fan_in, fan_out), jnp.float32, -bound, bound)
        b = jax.random.uniform(kb, (1, fan_out), jnp.float32, -bound, bound)
        return w, b

    w1, b1 = lin(ks[0], ks[1], vocab_size, hidden)
    w2, b2 = lin(ks[2], ks[3], hidden, hidden)
    wmu, bmu = lin(ks[4], ks[5], hidden, num_topics)
    wlv, blv = lin(ks[6], ks[7], hidden, num_topics)
    return dict(w1=w1, b1=b1, w2=w2, b2=b2,
                wmu=wmu, bmu=bmu, wlv=wlv, blv=blv)


def encoder_reference(x, prm):
    """Pure-JAX f32 reference mirroring the PyTorch module."""
    dot = functools.partial(jnp.dot, preferred_element_type=jnp.float32,
                            precision=_PRECISION)
    h = _softplus(dot(x, prm["w1"]) + prm["b1"])
    h = _softplus(dot(h, prm["w2"]) + prm["b2"])
    mu = dot(h, prm["wmu"]) + prm["bmu"]
    lv = dot(h, prm["wlv"]) + prm["blv"]

    def bn(z):
        m = jnp.mean(z, axis=0, keepdims=True)
        v = jnp.mean((z - m) ** 2, axis=0, keepdims=True)
        return (z - m) / jnp.sqrt(v + EPS)

    return bn(mu), jnp.exp(0.5 * bn(lv))


if __name__ == "__main__":
    # small shapes consistent with the module
    batch, vocab_size, hidden, num_topics = 8, 128, 32, 20

    key = jax.random.PRNGKey(0)
    k_x, k_p = jax.random.split(key)

    x = jax.random.uniform(k_x, (batch, vocab_size), jnp.float32)
    params = init_params(k_p, vocab_size, num_topics, hidden)

    prep = prepare_params(params)          # one-time weight prep (hoisted)

    loc, scale = encoder_forward(x, prep)
    jax.block_until_ready((loc, scale))

    loc_ref, scale_ref = encoder_reference(x, params)
    assert loc.shape == (batch, num_topics) and scale.shape == (batch, num_topics)
    assert jnp.allclose(loc, loc_ref, atol=5e-3, rtol=5e-3), \
        float(jnp.max(jnp.abs(loc - loc_ref)))
    assert jnp.allclose(scale, scale_ref, atol=5e-3, rtol=5e-3), \
        float(jnp.max(jnp.abs(scale - scale_ref)))

    print("KERNEL_OK")
</pallas_src>

<mosaic_0001>
module attributes {stable_mosaic.version = 11 : i64} {
  func.func @_encoder_mlp_kernel(%arg0: i32, %arg1: memref<8x128xf32, #tpu.memory_space<vmem>>, %arg2: memref<128x128xf32, #tpu.memory_space<vmem>>, %arg3: memref<1x128xf32, #tpu.memory_space<vmem>>, %arg4: memref<128x128xf32, #tpu.memory_space<vmem>>, %arg5: memref<1x128xf32, #tpu.memory_space<vmem>>, %arg6: memref<128x128xf32, #tpu.memory_space<vmem>>, %arg7: memref<1x128xf32, #tpu.memory_space<vmem>>, %arg8: memref<8x128xf32, #tpu.memory_space<vmem>>, %arg9: memref<1x2x128xf32, #tpu.memory_space<vmem>>) attributes {dimension_semantics = [#tpu.dimension_semantics<parallel>], iteration_bounds = array<i64: 1>, scalar_prefetch = 0 : i64, scratch_operands = 0 : i64, tpu.core_type = #tpu.core_type<tc>, window_params = [{transform_indices = @transform_0, window_bounds = array<i64: 8, 128>}, {pipeline_mode = #tpu.pipeline_mode<synchronous>, transform_indices = @transform_1, window_bounds = array<i64: 128, 128>}, {pipeline_mode = #tpu.pipeline_mode<synchronous>, transform_indices = @transform_2, window_bounds = array<i64: 1, 128>}, {pipeline_mode = #tpu.pipeline_mode<synchronous>, transform_indices = @transform_3, window_bounds = array<i64: 128, 128>}, {pipeline_mode = #tpu.pipeline_mode<synchronous>, transform_indices = @transform_4, window_bounds = array<i64: 1, 128>}, {pipeline_mode = #tpu.pipeline_mode<synchronous>, transform_indices = @transform_5, window_bounds = array<i64: 128, 128>}, {pipeline_mode = #tpu.pipeline_mode<synchronous>, transform_indices = @transform_6, window_bounds = array<i64: 1, 128>}, {transform_indices = @transform_7, window_bounds = array<i64: 8, 128>}, {transform_indices = @transform_8, window_bounds = array<i64: 1, 2, 128>}]} {
    %c0 = arith.constant 0 : index
    %c0_0 = arith.constant 0 : index
    %0 = vector.load %arg1[%c0, %c0_0] : memref<8x128xf32, #tpu.memory_space<vmem>>, vector<8x128xf32>
    %c0_1 = arith.constant 0 : index
    %c0_2 = arith.constant 0 : index
    %1 = vector.load %arg2[%c0_1, %c0_2] : memref<128x128xf32, #tpu.memory_space<vmem>>, vector<128x128xf32>
    %cst = arith.constant dense<0.000000e+00> : vector<8x128xf32>
    %2 = tpu.matmul %0, %1, %cst {dimension_numbers = #tpu.dot_dimension_numbers<[1], [0], [0], [1], [0, 0, 1, 1], [], []>, precision = #tpu.contract_precision<fp32>} : vector<8x128xf32>, vector<128x128xf32>, vector<8x128xf32> -> vector<8x128xf32>
    %c0_3 = arith.constant 0 : index
    %c0_4 = arith.constant 0 : index
    %3 = vector.load %arg3[%c0_3, %c0_4] : memref<1x128xf32, #tpu.memory_space<vmem>>, vector<1x128xf32>
    %4 = vector.broadcast %3 : vector<1x128xf32> to vector<8x128xf32>
    %5 = arith.addf %2, %4 : vector<8x128xf32>
    %cst_5 = arith.constant 0.000000e+00 : f32
    %6 = vector.broadcast %cst_5 : f32 to vector<8x128xf32>
    %7 = arith.maximumf %5, %6 : vector<8x128xf32>
    %8 = vector.broadcast %cst_5 : f32 to vector<8x128xf32>
    %9 = arith.subf %5, %8 : vector<8x128xf32>
    %10 = arith.cmpf one, %9, %9 : vector<8x128xf32>
    %11 = vector.broadcast %cst_5 : f32 to vector<8x128xf32>
    %12 = arith.addf %5, %11 : vector<8x128xf32>
    %13 = math.absf %9 : vector<8x128xf32>
    %cst_6 = arith.constant 0.000000e+00 : f32
    %14 = vector.broadcast %cst_6 : f32 to vector<8x128xf32>
    %15 = arith.subf %14, %13 : vector<8x128xf32>
    %16 = math.exp %15 : vector<8x128xf32>
    %17 = math.log1p %16 : vector<8x128xf32>
    %18 = arith.addf %7, %17 : vector<8x128xf32>
    %19 = arith.select %10, %12, %18 : vector<8x128xi1>, vector<8x128xf32>
    %c0_7 = arith.constant 0 : index
    %c0_8 = arith.constant 0 : index
    %20 = vector.load %arg4[%c0_7, %c0_8] : memref<128x128xf32, #tpu.memory_space<vmem>>, vector<128x128xf32>
    %cst_9 = arith.constant dense<0.000000e+00> : vector<8x128xf32>
    %21 = tpu.matmul %19, %20, %cst_9 {dimension_numbers = #tpu.dot_dimension_numbers<[1], [0], [0], [1], [0, 0, 1, 1], [], []>, precision = #tpu.contract_precision<fp32>} : vector<8x128xf32>, vector<128x128xf32>, vector<8x128xf32> -> vector<8x128xf32>
    %c0_10 = arith.constant 0 : index
    %c0_11 = arith.constant 0 : index
    %22 = vector.load %arg5[%c0_10, %c0_11] : memref<1x128xf32, #tpu.memory_space<vmem>>, vector<1x128xf32>
    %23 = vector.broadcast %22 : vector<1x128xf32> to vector<8x128xf32>
    %24 = arith.addf %21, %23 : vector<8x128xf32>
    %cst_12 = arith.constant 0.000000e+00 : f32
    %25 = vector.broadcast %cst_12 : f32 to vector<8x128xf32>
    %26 = arith.maximumf %24, %25 : vector<8x128xf32>
    %27 = vector.broadcast %cst_12 : f32 to vector<8x128xf32>
    %28 = arith.subf %24, %27 : vector<8x128xf32>
    %29 = arith.cmpf one, %28, %28 : vector<8x128xf32>
    %30 = vector.broadcast %cst_12 : f32 to vector<8x128xf32>
    %31 = arith.addf %24, %30 : vector<8x128xf32>
    %32 = math.absf %28 : vector<8x128xf32>
    %cst_13 = arith.constant 0.000000e+00 : f32
    %33 = vector.broadcast %cst_13 : f32 to vector<8x128xf32>
    %34 = arith.subf %33, %32 : vector<8x128xf32>
    %35 = math.exp %34 : vector<8x128xf32>
    %36 = math.log1p %35 : vector<8x128xf32>
    %37 = arith.addf %26, %36 : vector<8x128xf32>
    %38 = arith.select %29, %31, %37 : vector<8x128xi1>, vector<8x128xf32>
    %c0_14 = arith.constant 0 : index
    %c0_15 = arith.constant 0 : index
    %39 = vector.load %arg6[%c0_14, %c0_15] : memref<128x128xf32, #tpu.memory_space<vmem>>, vector<128x128xf32>
    %cst_16 = arith.constant dense<0.000000e+00> : vector<8x128xf32>
    %40 = tpu.matmul %38, %39, %cst_16 {dimension_numbers = #tpu.dot_dimension_numbers<[1], [0], [0], [1], [0, 0, 1, 1], [], []>, precision = #tpu.contract_precision<fp32>} : vector<8x128xf32>, vector<128x128xf32>, vector<8x128xf32> -> vector<8x128xf32>
    %c0_17 = arith.constant 0 : index
    %c0_18 = arith.constant 0 : index
    %41 = vector.load %arg7[%c0_17, %c0_18] : memref<1x128xf32, #tpu.memory_space<vmem>>, vector<1x128xf32>
    %42 = vector.broadcast %41 : vector<1x128xf32> to vector<8x128xf32>
    %43 = arith.addf %40, %42 : vector<8x128xf32>
    %c0_19 = arith.constant 0 : index
    %c0_20 = arith.constant 0 : index
    %44 = vector.load %arg8[%c0_19, %c0_20] : memref<8x128xf32, #tpu.memory_space<vmem>>, vector<8x128xf32>
    tpu.vector_store %arg8[%c0_19, %c0_20], %43 {strides = array<i32>} : memref<8x128xf32, #tpu.memory_space<vmem>>, vector<8x128xf32>,
    %cst_21 = arith.constant dense<0.000000e+00> : vector<128xf32>
    %45 = vector.multi_reduction <add>, %43, %cst_21 [0] : vector<8x128xf32> to vector<128xf32>
    %46 = vector.shape_cast %45 : vector<128xf32> to vector<1x128xf32>
    %47 = arith.mulf %43, %43 : vector<8x128xf32>
    %cst_22 = arith.constant dense<0.000000e+00> : vector<128xf32>
    %48 = vector.multi_reduction <add>, %47, %cst_22 [0] : vector<8x128xf32> to vector<128xf32>
    %49 = vector.shape_cast %48 : vector<128xf32> to vector<1x128xf32>
    %50 = tpu.concatenate %46, %49 in 0 : vector<1x128xf32>, vector<1x128xf32> -> vector<2x128xf32>
    %51 = vector.shape_cast %50 : vector<2x128xf32> to vector<1x2x128xf32>
    %c0_23 = arith.constant 0 : index
    %c0_24 = arith.constant 0 : index
    %c0_25 = arith.constant 0 : index
    %52 = vector.load %arg9[%c0_23, %c0_24, %c0_25] : memref<1x2x128xf32, #tpu.memory_space<vmem>>, vector<1x2x128xf32>
    tpu.vector_store %arg9[%c0_23, %c0_24, %c0_25], %51 {strides = array<i32>} : memref<1x2x128xf32, #tpu.memory_space<vmem>>, vector<1x2x128xf32>,
    return
  }
  func.func @transform_0(%arg0: i32) -> (i32, i32) {
    %c0_i32 = arith.constant 0 : i32
    %c0_i32_0 = arith.constant 0 : i32
    return %arg0, %c0_i32 : i32, i32
  }
  func.func @transform_1(%arg0: i32) -> (i32, i32) {
    %c0_i32 = arith.constant 0 : i32
    %c0_i32_0 = arith.constant 0 : i32
    %c0_i32_1 = arith.constant 0 : i32
    return %c0_i32, %c0_i32_0 : i32, i32
  }
  func.func @transform_2(%arg0: i32) -> (i32, i32) {
    %c0_i32 = arith.constant 0 : i32
    %c0_i32_0 = arith.constant 0 : i32
    %c0_i32_1 = arith.constant 0 : i32
    return %c0_i32, %c0_i32_0 : i32, i32
  }
  func.func @transform_3(%arg0: i32) -> (i32, i32) {
    %c0_i32 = arith.constant 0 : i32
    %c0_i32_0 = arith.constant 0 : i32
    %c0_i32_1 = arith.constant 0 : i32
    return %c0_i32, %c0_i32_0 : i32, i32
  }
  func.func @transform_4(%arg0: i32) -> (i32, i32) {
    %c0_i32 = arith.constant 0 : i32
    %c0_i32_0 = arith.constant 0 : i32
    %c0_i32_1 = arith.constant 0 : i32
    return %c0_i32, %c0_i32_0 : i32, i32
  }
  func.func @transform_5(%arg0: i32) -> (i32, i32) {
    %c0_i32 = arith.constant 0 : i32
    %c0_i32_0 = arith.constant 0 : i32
    %c0_i32_1 = arith.constant 0 : i32
    return %c0_i32, %c0_i32_0 : i32, i32
  }
  func.func @transform_6(%arg0: i32) -> (i32, i32) {
    %c0_i32 = arith.constant 0 : i32
    %c0_i32_0 = arith.constant 0 : i32
    %c0_i32_1 = arith.constant 0 : i32
    return %c0_i32, %c0_i32_0 : i32, i32
  }
  func.func @transform_7(%arg0: i32) -> (i32, i32) {
    %c0_i32 = arith.constant 0 : i32
    %c0_i32_0 = arith.constant 0 : i32
    return %arg0, %c0_i32 : i32, i32
  }
  func.func @transform_8(%arg0: i32) -> (i32, i32, i32) {
    %c0_i32 = arith.constant 0 : i32
    %c0_i32_0 = arith.constant 0 : i32
    %c0_i32_1 = arith.constant 0 : i32
    return %arg0, %c0_i32, %c0_i32_0 : i32, i32, i32
  }
}

</mosaic_0001>

<bundles_post_ra>
// kernel: tpu_custom_call.1
= control target key start
LH: loop header
LB: loop body
LE: loop exit
PB: predicated region body
PF: predicated region fallthrough
CT: control target
= control target key end

     0   :  { %14 = vsyncpa [#allocation3], 0  ;;  %s4659_s0 = inlined_call_operand.hbm [shape: f32[8,128], index: 0, kind: input, shape index: {}]   ;;  %s4660_s1 = inlined_call_operand.hbm [shape: f32[128,128], index: 1, kind: input, shape index: {}]   ;;  %s4661_s2 = inlined_call_operand.vmem [shape: f32[1,128], index: 2, kind: input, shape index: {}]   ;;  %s4662_s3 = inlined_call_operand.hbm [shape: f32[128,128], index: 3, kind: input, shape index: {}]   ;;  %s4663_s4 = inlined_call_operand.vmem [shape: f32[1,128], index: 4, kind: input, shape index: {}]   ;;  %s4664_s5 = inlined_call_operand.hbm [shape: f32[128,128], index: 5, kind: input, shape index: {}]   ;;  %s4665_s6 = inlined_call_operand.vmem [shape: f32[1,128], index: 6, kind: input, shape index: {}]   ;;  %s4666_s7 = inlined_call_operand.hbm [shape: f32[8,128], index: 7, kind: output, shape index: {0}]   ;;  %s4667_s8 = inlined_call_operand.hbm [shape: f32[1,2,128], index: 8, kind: output, shape index: {1}]  }
   0x1   :  { %15 = vsyncpa [#allocation6], 0 }
   0x2   :  { %16 = vsyncpa [#allocation9], 0 }
   0x3   :  { %17 = vsyncpa [#allocation4], 0 }
   0x4   :  { %18 = vsyncpa [#allocation12], 0  ;;  %s3724_s27 = smov [#allocation5]   ;;  %s3582_s9 = scalar_lea.hbm %s4660_s1, 2048 }
   0x5   :  { %s34_s28 = sshll.u32 %s3724_s27, 4  ;;  %p3583_p0 = scmp.ne.s32.totalorder %s4660_s1, %s3582_s9  ;;  %s35_s28 = int_to_ptr.vmem [resolvable:$true] %s34_s28 }
   0x6   :  { %p3586_p1 = scmp.lt.u32.totalorder %s3582_s9, %s4660_s1 }
   0x8   :  { %p3588_p2 = pnand %p3586_p1, %p3583_p0 }
   0xa   :  { %3591 = shalt.err (!%p3588_p2)
}
   0xb   :  { %s3592_s14 = scalar_lea.vmem %s35_s28, 2048  ;;  %p3597_p4 = scmp.lt.s32.totalorder %s35_s28, %s35_s28 }
   0xc   :  { %p3593_p3 = scmp.ne.s32.totalorder %s35_s28, %s3592_s14  ;;  %p3598_p5 = scmp.lt.s32.totalorder %s3592_s14, %s3592_s14 }
   0xe   :  { %p3599_p6 = por %p3598_p5, %p3597_p4 }
  0x10   :  { %p3600_p7 = pnand %p3599_p6, %p3593_p3 }
  0x12   :  { %3603 = shalt.err (!%p3600_p7)
}
  0x13   :  { %s3725_s15 = smov 128   ;;  %s3726_s16 = smov 8  }
  0x14   :  { %40 = dma.hbm_to_vmem [thread:$0]  %s4660_s1, 2048, %s35_s28, [#allocation6], %s3725_s15, %s3725_s15, %s3726_s16  }
  0x15   :  { %s3727_s19 = smov [#allocation2]   ;;  %s3728_s21 = smov [#allocation7]  }
  0x16   :  { %s25_s20 = sshll.u32 %s3727_s19, 4  ;;  %s48_s22 = sshll.u32 %s3728_s21, 4  ;;  %s26_s20 = int_to_ptr.vmem [resolvable:$true] %s25_s20  ;;  %s49_s22 = int_to_ptr.vmem [resolvable:$true] %s48_s22 }
  0x17   :  { %s3604_s25 = scalar_lea.hbm %s4659_s0, 128 }
  0x18   :  { %p3605_p8 = scmp.ne.s32.totalorder %s4659_s0, %s3604_s25  ;;  %p3608_p9 = scmp.lt.u32.totalorder %s3604_s25, %s4659_s0 }
  0x1a   :  { %p3610_p10 = pnand %p3608_p9, %p3605_p8 }
  0x1c   :  { %3613 = shalt.err (!%p3610_p10)
}
  0x1d   :  { %s3614_s1 = scalar_lea.vmem %s26_s20, 128  ;;  %p3619_p12 = scmp.lt.s32.totalorder %s26_s20, %s26_s20 }
  0x1e   :  { %p3615_p11 = scmp.ne.s32.totalorder %s26_s20, %s3614_s1  ;;  %p3620_p13 = scmp.lt.s32.totalorder %s3614_s1, %s3614_s1 }
  0x20   :  { %p3621_p0 = por %p3620_p13, %p3619_p12 }
  0x22   :  { %p3622_p1 = pnand %p3621_p0, %p3615_p11 }
  0x24   :  { %3625 = shalt.err (!%p3622_p1)
}
  0x25   :  { %28 = dma.hbm_to_vmem [thread:$0]  %s4659_s0, 128, %s26_s20, [#allocation3]  }
  0x26   :  { %s3626_s12 = scalar_lea.hbm %s4662_s3, 2048 }
  0x27   :  { %p3627_p2 = scmp.ne.s32.totalorder %s4662_s3, %s3626_s12  ;;  %p3630_p3 = scmp.lt.u32.totalorder %s3626_s12, %s4662_s3 }
  0x29   :  { %p3632_p4 = pnand %p3630_p3, %p3627_p2 }
  0x2b   :  { %3635 = shalt.err (!%p3632_p4)
}
  0x2c   :  { %s3636_s19 = scalar_lea.vmem %s49_s22, 2048  ;;  %p3641_p6 = scmp.lt.s32.totalorder %s49_s22, %s49_s22 }
  0x2d   :  { %p3637_p5 = scmp.ne.s32.totalorder %s49_s22, %s3636_s19  ;;  %p3642_p7 = scmp.lt.s32.totalorder %s3636_s19, %s3636_s19 }
  0x2f   :  { %p3643_p8 = por %p3642_p7, %p3641_p6 }
  0x31   :  { %p3644_p9 = pnand %p3643_p8, %p3637_p5 }
  0x33   :  { %3647 = shalt.err (!%p3644_p9)
}
  0x34   :  { %54 = dma.hbm_to_vmem [thread:$0]  %s4662_s3, 2048, %s49_s22, [#allocation6], %s3725_s15, %s3725_s15, %s3726_s16  }
  0x35   :  { %s3729_s21 = smov [#allocation8]   ;;  %s3648_s26 = scalar_lea.hbm %s4664_s5, 2048 }
  0x36   :  { %s62_s23 = sshll.u32 %s3729_s21, 4  ;;  %p3649_p10 = scmp.ne.s32.totalorder %s4664_s5, %s3648_s26  ;;  %s63_s23 = int_to_ptr.vmem [resolvable:$true] %s62_s23 }
  0x37   :  { %p3652_p11 = scmp.lt.u32.totalorder %s3648_s26, %s4664_s5 }
  0x39   :  { %p3654_p12 = pnand %p3652_p11, %p3649_p10 }
  0x3b   :  { %3657 = shalt.err (!%p3654_p12)
}
  0x3c   :  { %s3658_s28 = scalar_lea.vmem %s63_s23, 2048  ;;  %p3663_p0 = scmp.lt.s32.totalorder %s63_s23, %s63_s23 }
  0x3d   :  { %p3659_p13 = scmp.ne.s32.totalorder %s63_s23, %s3658_s28  ;;  %p3664_p1 = scmp.lt.s32.totalorder %s3658_s28, %s3658_s28 }
  0x3f   :  { %p3665_p2 = por %p3664_p1, %p3663_p0 }
  0x41   :  { %p3666_p3 = pnand %p3665_p2, %p3659_p13 }
  0x43   :  { %3669 = shalt.err (!%p3666_p3)
}
  0x44   :  { %68 = dma.hbm_to_vmem [thread:$0]  %s4664_s5, 2048, %s63_s23, [#allocation9], %s3725_s15, %s3725_s15, %s3726_s16  }
  0x45   :  { %3714 = dma.done.wait [#allocation3], 128  }
  0x46   :  { %3715 = vsyncadd [#allocation3], 4294967168 }
  0x47   :  { %3716 = dma.done.wait [#allocation6], 4096  }
  0x48   :  { %3717 = vsyncadd [#allocation6], 4294963200 }
  0x49   :  { %3718 = dma.done.wait [#allocation9], 2048  }
  0x4a   :  { %3719 = vsyncadd [#allocation9], 4294965248  ;;  %v3730_v0 = vmov 0.0|0.0   ;;  %vm3731_vm0 = vmmov 0   ;;  %v3732_v1 = vmov 0.0   ;;  %v84_v2 = vld [vmem:[#allocation5] sm:$0xff] }
  0x4b   :  { %3099 = vmatprep.subr.bf16.mxu1 %v3730_v0  ;;  %3171 = vmatprep.subr.bf16.mxu0 %v3730_v0  ;;  %v85_v3 = vld [vmem:[#allocation5 + $0x8] sm:$0xff]  ;;  %v86_v4 = vld [vmem:[#allocation5 + $0x10] sm:$0xff]  ;;  %v108_v5 = vand.u32 4294901760, %v84_v2  ;;  %v87_v7 = vld [vmem:[#allocation5 + $0x18] sm:$0xff]  ;;  %s3733_s10 = smov [#allocation10]  }
  0x4c   :  { %2501 = vmatprep.mubr.msk.f32.mxu1 %vm3731_vm0, %v3732_v1  ;;  %2606 = vmatprep.mubr.msk.f32.mxu0 %vm3731_vm0, %v3732_v1  ;;  %v111_v6 = vand.u32 4294901760, %v85_v3  ;;  %v114_v8 = vand.u32 4294901760, %v86_v4  ;;  %v117_v9 = vand.u32 4294901760, %v87_v7  ;;  %v88_v10 = vld [vmem:[#allocation5 + $0x20] sm:$0xff]  ;;  %v89_v11 = vld [vmem:[#allocation5 + $0x28] sm:$0xff]  ;;  %v90_v16 = vld [vmem:[#allocation5 + $0x30] sm:$0xff] }
  0x4d   :  { %v120_v14 = vand.u32 4294901760, %v88_v10  ;;  %v123_v15 = vand.u32 4294901760, %v89_v11  ;;  %v91_v17 = vld [vmem:[#allocation5 + $0x38] sm:$0xff]  ;;  %v126_v19 = vand.u32 4294901760, %v90_v16  ;;  %v3857_v21 = vld [vmem:[#allocation5 + $0x40] sm:$0xff]  ;;  %v3859_v22 = vld [vmem:[#allocation5 + $0x48] sm:$0xff]  ;;  %v3873_v29 = vsub.f32 %v84_v2, %v108_v5 }
  0x4e   :  { %v3843_v12 = vpack.c.bf16 %v111_v6, %v108_v5  ;;  %v3847_v13 = vpack.c.bf16 %v117_v9, %v114_v8  ;;  %v129_v20 = vand.u32 4294901760, %v91_v17  ;;  %v132_v24 = vand.u32 4294901760, %v3857_v21  ;;  %v83_v26 = vld [vmem:[#allocation2] sm:$0xff]  ;;  %v3869_v27 = vld [vmem:[#allocation5 + $0x50] sm:$0xff]  ;;  %v3885_v35 = vld [vmem:[#allocation5 + $0x60] sm:$0xff]  ;;  %s2135_s11 = sshll.u32 %s3733_s10, 4  ;;  %s2136_s11 = int_to_ptr.vmem [resolvable:$true] %s2135_s11 }
  0x4f   :  { %v3853_v18 = vpack.c.bf16 %v123_v15, %v120_v14  ;;  %v135_v25 = vand.u32 4294901760, %v3859_v22  ;;  %v3871_v28 = vld [vmem:[#allocation5 + $0x58] sm:$0xff]  ;;  %v3875_v30 = vand.u32 4294901760, %v83_v26  ;;  %v3877_v31 = vsub.f32 %v85_v3, %v111_v6  ;;  %v3889_v36 = vld [vmem:[#allocation5 + $0x68] sm:$0xff]  ;;  %v3908_v43 = vld [vmem:[#allocation5 + $0x70] sm:$0xff]  ;;  %s3670_s12 = scalar_lea.vmem %s2136_s11, 128  ;;  %p3675_p5 = scmp.lt.s32.totalorder %s2136_s11, %s2136_s11 }
  0x50   :  { %3101 = vmatpush3.bf16.msra.mxu1 %v3843_v12  ;;  %3173 = vmatpush3.bf16.msra.mxu0 %v3843_v12  ;;  %v3863_v23 = vpack.c.bf16 %v129_v20, %v126_v19  ;;  %v138_v33 = vand.u32 4294901760, %v3869_v27  ;;  %v141_v34 = vand.u32 4294901760, %v3871_v28  ;;  %v3891_v37 = vsub.f32 %v86_v4, %v114_v8  ;;  %v3910_v44 = vld [vmem:[#allocation5 + $0x78] sm:$0xff]  ;;  %p3671_p4 = scmp.ne.s32.totalorder %s2136_s11, %s3670_s12  ;;  %p3676_p6 = scmp.lt.s32.totalorder %s3670_s12, %s3670_s12 }
  0x51   :  { %3102 = vmatprep.subr.bf16.mxu1 %v3730_v0  ;;  %3174 = vmatprep.subr.bf16.mxu0 %v3730_v0  ;;  %v3881_v32 = vpack.c.bf16 %v135_v25, %v132_v24  ;;  %v3893_v38 = vsub.f32 %v87_v7, %v117_v9  ;;  %v144_v39 = vand.u32 4294901760, %v3885_v35  ;;  %v3897_v40 = vsub.f32 %v83_v26, %v3875_v30 }
  0x52   :  { %v3905_v41 = vpack.c.bf16 %v141_v34, %v138_v33  ;;  %v147_v42 = vand.u32 4294901760, %v3889_v36  ;;  %v201_v45 = vand.u32 4294901760, %v3873_v29  ;;  %v208_v46 = vand.u32 4294901760, %v3877_v31  ;;  %p3677_p7 = por %p3676_p6, %p3675_p5 }
  0x53   :  { %v3916_v47 = vsub.f32 %v88_v10, %v120_v14  ;;  %v3918_v48 = vsub.f32 %v89_v11, %v123_v15  ;;  %v150_v49 = vand.u32 4294901760, %v3908_v43  ;;  %v153_v50 = vand.u32 4294901760, %v3910_v44 }
  0x54   :  { %3104 = vmatpush3.bf16.msra.mxu1 %v3847_v13  ;;  %3176 = vmatpush3.bf16.msra.mxu0 %v3847_v13  ;;  %v190_v51 = vand.u32 4294901760, %v3897_v40  ;;  %v215_v52 = vand.u32 4294901760, %v3891_v37  ;;  %v3930_v53 = vpack.c.bf16 %v147_v42, %v144_v39  ;;  %v202_v54 = vsub.f32 %v3873_v29, %v201_v45  ;;  %p3678_p8 = pnand %p3677_p7, %p3671_p4 }
  0x55   :  { %3105 = vmatprep.subr.bf16.mxu1 %v3730_v0  ;;  %3177 = vmatprep.subr.bf16.mxu0 %v3730_v0  ;;  %v209_v55 = vsub.f32 %v3877_v31, %v208_v46  ;;  %v222_v56 = vand.u32 4294901760, %v3893_v38  ;;  %v3937_v57 = vsub.f32 %v90_v16, %v126_v19  ;;  %v3939_v58 = vsub.f32 %v91_v17, %v129_v20 }
  0x56   :  { %v191_v59 = vsub.f32 %v3897_v40, %v190_v51  ;;  %v216_v60 = vsub.f32 %v3891_v37, %v215_v52  ;;  %v229_v61 = vand.u32 4294901760, %v3916_v47  ;;  %v236_v62 = vand.u32 4294901760, %v3918_v48 }
  0x57   :  { %v3951_v63 = vpack.c.bf16 %v153_v50, %v150_v49  ;;  %v203_v2 = vand.u32 4294901760, %v202_v54  ;;  %v210_v3 = vand.u32 4294901760, %v209_v55  ;;  %v223_v4 = vsub.f32 %v3893_v38, %v222_v56 }
  0x58   :  { %3107 = vmatpush3.bf16.msra.mxu1 %v3853_v18  ;;  %3179 = vmatpush3.bf16.msra.mxu0 %v3853_v18  ;;  %v3957_v5 = vsub.f32 %v3857_v21, %v132_v24  ;;  %v3960_v6 = vsub.f32 %v3859_v22, %v135_v25  ;;  %v3196_v7 = vpack.c.bf16 %v208_v46, %v201_v45  ;;  %v192_v8 = vand.u32 4294901760, %v191_v59 }
  0x59   :  { %3108 = vmatprep.subr.bf16.mxu1 %v3730_v0  ;;  %3180 = vmatprep.subr.bf16.mxu0 %v3730_v0  ;;  %v217_v9 = vand.u32 4294901760, %v216_v60  ;;  %v230_v10 = vsub.f32 %v3916_v47, %v229_v61  ;;  %v237_v11 = vsub.f32 %v3918_v48, %v236_v62  ;;  %v3124_v14 = vpack.c.bf16 %v210_v3, %v203_v2 }
  0x5a   :  { %v224_v15 = vand.u32 4294901760, %v223_v4  ;;  %v243_v16 = vand.u32 4294901760, %v3937_v57  ;;  %v250_v17 = vand.u32 4294901760, %v3939_v58  ;;  %v3973_v19 = vsub.f32 %v3869_v27, %v138_v33 }
  0x5b   :  { %v3978_v20 = vsub.f32 %v3871_v28, %v141_v34  ;;  %v3199_v21 = vpack.c.bf16 %v222_v56, %v215_v52  ;;  %v231_v22 = vand.u32 4294901760, %v230_v10  ;;  %v238_v24 = vand.u32 4294901760, %v237_v11 }
  0x5c   :  { %3110 = vmatpush3.bf16.msra.mxu1 %v3863_v23  ;;  %3182 = vmatpush3.bf16.msra.mxu0 %v3863_v23  ;;  %v257_v25 = vand.u32 4294901760, %v3957_v5  ;;  %v3127_v26 = vpack.c.bf16 %v224_v15, %v217_v9  ;;  %v244_v45 = vsub.f32 %v3937_v57, %v243_v16  ;;  %v251_v27 = vsub.f32 %v3939_v58, %v250_v17 }
  0x5d   :  { %3111 = vmatprep.subr.bf16.mxu1 %v3730_v0  ;;  %3183 = vmatprep.subr.bf16.mxu0 %v3730_v0  ;;  %v264_v33 = vand.u32 4294901760, %v3960_v6  ;;  %v3989_v28 = vsub.f32 %v3885_v35, %v144_v39  ;;  %v3994_v34 = vsub.f32 %v3889_v36, %v147_v42  ;;  %v3130_v46 = vpack.c.bf16 %v238_v24, %v231_v22 }
  0x5e   :  { %v258_v52 = vsub.f32 %v3957_v5, %v257_v25  ;;  %v271_v54 = vand.u32 4294901760, %v3973_v19  ;;  %v245_v35 = vand.u32 4294901760, %v244_v45  ;;  %v252_v39 = vand.u32 4294901760, %v251_v27 }
  0x5f   :  { %v265_v55 = vsub.f32 %v3960_v6, %v264_v33  ;;  %v278_v36 = vand.u32 4294901760, %v3978_v20  ;;  %v4009_v42 = vsub.f32 %v3908_v43, %v150_v49  ;;  %v4014_v56 = vsub.f32 %v3910_v44, %v153_v50 }
  0x60   :  { %3113 = vmatpush3.bf16.msra.mxu1 %v3881_v32  ;;  %3185 = vmatpush3.bf16.msra.mxu0 %v3881_v32  ;;  %v3205_v59 = vpack.c.bf16 %v250_v17, %v243_v16  ;;  %v259_v60 = vand.u32 4294901760, %v258_v52  ;;  %v3133_v2 = vpack.c.bf16 %v252_v39, %v245_v35  ;;  %v292_v43 = vand.u32 4294901760, %v3994_v34  ;;  %v774_v35 = vld [vmem:[#allocation7 + $0x40] sm:$0xff]  ;;  %v775_v39 = vld [vmem:[#allocation7 + $0x48] sm:$0xff] }
  0x61   :  { %3114 = vmatprep.subr.bf16.mxu1 %v3730_v0  ;;  %3186 = vmatprep.subr.bf16.mxu0 %v3730_v0  ;;  %v266_v3 = vand.u32 4294901760, %v265_v55  ;;  %v279_v4 = vsub.f32 %v3978_v20, %v278_v36  ;;  %v3208_v44 = vpack.c.bf16 %v264_v33, %v257_v25  ;;  %v306_v11 = vand.u32 4294901760, %v4014_v56 }
  0x62   :  { %v293_v10 = vsub.f32 %v3994_v34, %v292_v43  ;;  %v814_v55 = vand.u32 4294901760, %v774_v35 }
  0x63   :  { %v280_v9 = vand.u32 4294901760, %v279_v4  ;;  %v307_v22 = vsub.f32 %v4014_v56, %v306_v11 }
  0x64   :  { %3116 = vmatpush3.bf16.msra.mxu1 %v3905_v41  ;;  %3188 = vmatpush3.bf16.msra.mxu0 %v3905_v41  ;;  %v294_v17 = vand.u32 4294901760, %v293_v10 }
  0x65   :  { %3117 = vmatprep.subr.bf16.mxu1 %v3730_v0  ;;  %3189 = vmatprep.subr.bf16.mxu0 %v3730_v0  ;;  %v308_v45 = vand.u32 4294901760, %v307_v22 }
  0x68   :  { %3119 = vmatpush3.bf16.msra.mxu1 %v3930_v53  ;;  %3191 = vmatpush3.bf16.msra.mxu0 %v3930_v53 }
  0x69   :  { %3120 = vmatprep.subr.bf16.mxu1 %v3730_v0  ;;  %3192 = vmatprep.subr.bf16.mxu0 %v3730_v0 }
  0x6c   :  { %3122 = vmatpush3.bf16.msra.mxu1 %v3951_v63  ;;  %3194 = vmatpush3.bf16.msra.mxu0 %v3951_v63 }
  0x6d   :  { %3123 = vmatprep.subr.bf16.mxu1 %v3730_v0  ;;  %3195 = vmatprep.subr.bf16.mxu0 %v3730_v0 }
  0x6f   :  { %2502 = vmatmul.mubr.f32.vlgmr.msra.gmra.mrb[0].mxu1 %v192_v8  ;;  %2607 = vmatmul.mubr.f32.vlgmr.msra.gmra.mrb[0].mxu0 %v190_v51  ;;  %v3202_v51 = vpack.c.bf16 %v236_v62, %v229_v61  ;;  %v272_v61 = vsub.f32 %v3973_v19, %v271_v54  ;;  %v285_v62 = vand.u32 4294901760, %v3989_v28  ;;  %v3136_v8 = vpack.c.bf16 %v266_v3, %v259_v60  ;;  %v779_v3 = vld [vmem:[#allocation7 + $0x68] sm:$0xff] }
  0x70   :  { %3125 = vmatpush3.bf16.msra.mxu1 %v3124_v14  ;;  %3197 = vmatpush3.bf16.msra.mxu0 %v3196_v7  ;;  %v299_v7 = vand.u32 4294901760, %v4009_v42  ;;  %v3211_v14 = vpack.c.bf16 %v278_v36, %v271_v54  ;;  %v817_v36 = vand.u32 4294901760, %v775_v39 }
  0x71   :  { %3126 = vmatprep.subr.bf16.mxu1 %v3730_v0  ;;  %3198 = vmatprep.subr.bf16.mxu0 %v3730_v0  ;;  %v273_v49 = vand.u32 4294901760, %v272_v61  ;;  %v286_v50 = vsub.f32 %v3989_v28, %v285_v62  ;;  %v3214_v25 = vpack.c.bf16 %v292_v43, %v285_v62  ;;  %v829_v43 = vand.u32 4294901760, %v779_v3 }
  0x72   :  { %2536 = vmatprep.mubr.msk.f32.mxu1 %vm3731_vm0, %v3732_v1  ;;  %2641 = vmatprep.mubr.msk.f32.mxu0 %vm3731_vm0, %v3732_v1  ;;  %v3217_v33 = vpack.c.bf16 %v306_v11, %v299_v7  ;;  %v780_v11 = vld [vmem:[#allocation7 + $0x70] sm:$0xff] }
  0x73   :  { %v287_v15 = vand.u32 4294901760, %v286_v50  ;;  %v3139_v16 = vpack.c.bf16 %v280_v9, %v273_v49 }
  0x74   :  { %3128 = vmatpush3.bf16.msra.mxu1 %v3127_v26  ;;  %3200 = vmatpush3.bf16.msra.mxu0 %v3199_v21  ;;  %v300_v21 = vsub.f32 %v4009_v42, %v299_v7 }
  0x75   :  { %3129 = vmatprep.subr.bf16.mxu1 %v3730_v0  ;;  %3201 = vmatprep.subr.bf16.mxu0 %v3730_v0  ;;  %v3142_v24 = vpack.c.bf16 %v294_v17, %v287_v15  ;;  %v4133_v17 = vsub.f32 %v774_v35, %v814_v55 }
  0x76   :  { %v301_v26 = vand.u32 4294901760, %v300_v21  ;;  %v4135_v21 = vsub.f32 %v775_v39, %v817_v36 }
  0x78   :  { %3131 = vmatpush3.bf16.msra.mxu1 %v3130_v46  ;;  %3203 = vmatpush3.bf16.msra.mxu0 %v3202_v51  ;;  %v3145_v27 = vpack.c.bf16 %v308_v45, %v301_v26  ;;  %v3148_v46 = vpack.c.bf16 %v3877_v31, %v3873_v29  ;;  %v3151_v51 = vpack.c.bf16 %v3893_v38, %v3891_v37  ;;  %v767_v37 = vld [vmem:[#allocation7 + $0x8] sm:$0xff]  ;;  %v832_v45 = vand.u32 4294901760, %v780_v11 }
  0x79   :  { %3132 = vmatprep.subr.bf16.mxu1 %v3730_v0  ;;  %3204 = vmatprep.subr.bf16.mxu0 %v3730_v0  ;;  %v3154_v29 = vpack.c.bf16 %v3918_v48, %v3916_v47  ;;  %v3169_v31 = vpack.c.bf16 %v4014_v56, %v4009_v42  ;;  %v768_v48 = vld [vmem:[#allocation7 + $0x10] sm:$0xff]  ;;  %v4106_v42 = vpack.c.bf16 %v817_v36, %v814_v55 }
  0x7a   :  { %v776_v56 = vld [vmem:[#allocation7 + $0x50] sm:$0xff]  ;;  %v4144_v26 = vsub.f32 %v779_v3, %v829_v43 }
  0x7b   :  { %v820_v60 = vand.u32 4294901760, %v776_v56 }
  0x7c   :  { %3134 = vmatpush3.bf16.msra.mxu1 %v3133_v2  ;;  %3206 = vmatpush3.bf16.msra.mxu0 %v3205_v59  ;;  %v777_v59 = vld [vmem:[#allocation7 + $0x58] sm:$0xff]  ;;  %v778_v2 = vld [vmem:[#allocation7 + $0x60] sm:$0xff] }
  0x7d   :  { %3135 = vmatprep.subr.bf16.mxu1 %v3730_v0  ;;  %3207 = vmatprep.subr.bf16.mxu0 %v3730_v0  ;;  %v823_v61 = vand.u32 4294901760, %v777_v59  ;;  %v826_v4 = vand.u32 4294901760, %v778_v2  ;;  %v4138_v22 = vsub.f32 %v776_v56, %v820_v60 }
  0x7f   :  { %v4110_v62 = vpack.c.bf16 %v823_v61, %v820_v60  ;;  %v4118_v50 = vpack.c.bf16 %v829_v43, %v826_v4  ;;  %v4674_v60 = vand.u32 4294901760, %v4135_v21 }
  0x80   :  { %3137 = vmatpush3.bf16.msra.mxu1 %v3136_v8  ;;  %3209 = vmatpush3.bf16.msra.mxu0 %v3208_v44 }
  0x81   :  { %3138 = vmatprep.subr.bf16.mxu1 %v3730_v0  ;;  %3210 = vmatprep.subr.bf16.mxu0 %v3730_v0  ;;  %v947_v3 = vsub.f32 %v4135_v21, %v4674_v60 }
  0x83   :  { %v948_v43 = vand.u32 4294901760, %v947_v3 }
  0x84   :  { %3140 = vmatpush3.bf16.msra.mxu1 %v3139_v16  ;;  %3212 = vmatpush3.bf16.msra.mxu0 %v3211_v14  ;;  %v781_v14 = vld [vmem:[#allocation7 + $0x78] sm:$0xff] }
  0x85   :  { %3141 = vmatprep.subr.bf16.mxu1 %v3730_v0  ;;  %3213 = vmatprep.subr.bf16.mxu0 %v3730_v0 }
  0x88   :  { %3143 = vmatpush3.bf16.msra.mxu1 %v3142_v24  ;;  %3215 = vmatpush3.bf16.msra.mxu0 %v3214_v25  ;;  %v4140_v24 = vsub.f32 %v777_v59, %v823_v61  ;;  %v4142_v25 = vsub.f32 %v778_v2, %v826_v4  ;;  %v4675_v59 = vand.u32 4294901760, %v4133_v17 }
  0x89   :  { %3144 = vmatprep.subr.bf16.mxu1 %v3730_v0  ;;  %3216 = vmatprep.subr.bf16.mxu0 %v3730_v0 }
  0x8a   :  { %v940_v2 = vsub.f32 %v4133_v17, %v4675_v59 }
  0x8c   :  { %3146 = vmatpush3.bf16.msra.mxu1 %v3145_v27  ;;  %3218 = vmatpush3.bf16.msra.mxu0 %v3217_v33  ;;  %v835_v27 = vand.u32 4294901760, %v781_v14  ;;  %v941_v4 = vand.u32 4294901760, %v940_v2 }
  0x8d   :  { %3147 = vmatprep.subr.bf16.mxu1 %v3730_v0  ;;  %3219 = vmatprep.subr.bf16.mxu0 %v3730_v0 }
  0x8f   :  { %2537 = vmatmul.mubr.f32.vlgmr.msra.gmra.mrb[0].mxu1 %v3875_v30  ;;  %2642 = vmatmul.mubr.f32.vlgmr.msra.gmra.mrb[0].mxu0 %v3875_v30 }
  0x90   :  { %3149 = vmatpush3.bf16.msra.mxu1 %v3148_v46  ;;  %3221 = vmatpush3.bf16.msra.mxu0 %v3843_v12  ;;  %v3157_v12 = vpack.c.bf16 %v3939_v58, %v3937_v57  ;;  %v796_v57 = vand.u32 4294901760, %v768_v48  ;;  %v770_v58 = vld [vmem:[#allocation7 + $0x20] sm:$0xff] }
  0x91   :  { %3150 = vmatprep.subr.bf16.mxu1 %v3730_v0  ;;  %3222 = vmatprep.subr.bf16.mxu0 %v3730_v0 }
  0x92   :  { %2571 = vmatprep.mubr.msk.f32.mxu1 %vm3731_vm0, %v3732_v1  ;;  %2676 = vmatprep.mubr.msk.f32.mxu0 %vm3731_vm0, %v3732_v1  ;;  %v4120_v7 = vsub.f32 %v768_v48, %v796_v57 }
  0x94   :  { %3152 = vmatpush3.bf16.msra.mxu1 %v3151_v51  ;;  %3224 = vmatpush3.bf16.msra.mxu0 %v3847_v13  ;;  %v3160_v13 = vpack.c.bf16 %v3960_v6, %v3957_v5  ;;  %v802_v5 = vand.u32 4294901760, %v770_v58  ;;  %v4148_v51 = vpack.c.bf16 %v835_v27, %v832_v45 }
  0x95   :  { %3153 = vmatprep.subr.bf16.mxu1 %v3730_v0  ;;  %3225 = vmatprep.subr.bf16.mxu0 %v3730_v0 }
  0x96   :  { %v4124_v9 = vsub.f32 %v770_v58, %v802_v5 }
  0x98   :  { %3155 = vmatpush3.bf16.msra.mxu1 %v3154_v29  ;;  %3227 = vmatpush3.bf16.msra.mxu0 %v3853_v18  ;;  %v3163_v18 = vpack.c.bf16 %v3978_v20, %v3973_v19  ;;  %v772_v20 = vld [vmem:[#allocation7 + $0x30] sm:$0xff]  ;;  %v4150_v29 = vsub.f32 %v780_v11, %v832_v45  ;;  %v4679_v48 = vand.u32 4294901760, %v4124_v9  ;;  %v4673_v11 = vand.u32 4294901760, %v4138_v22 }
  0x99   :  { %3156 = vmatprep.subr.bf16.mxu1 %v3730_v0  ;;  %3228 = vmatprep.subr.bf16.mxu0 %v3730_v0  ;;  %v4204_v45 = vpack.c.bf16 %v948_v43, %v941_v4 }
  0x9c   :  { %3158 = vmatpush3.bf16.msra.mxu1 %v3157_v12  ;;  %3230 = vmatpush3.bf16.msra.mxu0 %v3863_v23  ;;  %v3166_v23 = vpack.c.bf16 %v3994_v34, %v3989_v28  ;;  %v773_v28 = vld [vmem:[#allocation7 + $0x38] sm:$0xff]  ;;  %v808_v34 = vand.u32 4294901760, %v772_v20  ;;  %v4152_v12 = vsub.f32 %v781_v14, %v835_v27  ;;  %v4672_v14 = vand.u32 4294901760, %v4140_v24 }
  0x9d   :  { %3159 = vmatprep.subr.bf16.mxu1 %v3730_v0  ;;  %3231 = vmatprep.subr.bf16.mxu0 %v3730_v0  ;;  %v811_v52 = vand.u32 4294901760, %v773_v28  ;;  %v954_v27 = vsub.f32 %v4138_v22, %v4673_v11 }
  0x9e   :  { %v4129_v15 = vsub.f32 %v772_v20, %v808_v34 }
  0x9f   :  { %v4102_v54 = vpack.c.bf16 %v811_v52, %v808_v34  ;;  %v4131_v16 = vsub.f32 %v773_v28, %v811_v52 }
  0xa0   :  { %3161 = vmatpush3.bf16.msra.mxu1 %v3160_v13  ;;  %3233 = vmatpush3.bf16.msra.mxu0 %v3881_v32  ;;  %v766_v32 = vld [vmem:[#allocation7] sm:$0xff]  ;;  %v4677_v34 = vand.u32 4294901760, %v4129_v15 }
  0xa1   :  { %3162 = vmatprep.subr.bf16.mxu1 %v3730_v0  ;;  %3234 = vmatprep.subr.bf16.mxu0 %v3730_v0  ;;  %v790_v38 = vand.u32 4294901760, %v766_v32  ;;  %v4676_v52 = vand.u32 4294901760, %v4131_v16 }
  0xa2   :  { %v926_v39 = vsub.f32 %v4129_v15, %v4677_v34 }
  0xa3   :  { %v4114_v44 = vsub.f32 %v766_v32, %v790_v38  ;;  %v933_v55 = vsub.f32 %v4131_v16, %v4676_v52 }
  0xa4   :  { %3164 = vmatpush3.bf16.msra.mxu1 %v3163_v18  ;;  %3236 = vmatpush3.bf16.msra.mxu0 %v3905_v41  ;;  %v793_v41 = vand.u32 4294901760, %v767_v37  ;;  %v927_v36 = vand.u32 4294901760, %v926_v39 }
  0xa5   :  { %3165 = vmatprep.subr.bf16.mxu1 %v3730_v0  ;;  %3237 = vmatprep.subr.bf16.mxu0 %v3730_v0  ;;  %v883_v33 = vand.u32 4294901760, %v4114_v44  ;;  %v934_v56 = vand.u32 4294901760, %v933_v55 }
  0xa6   :  { %v4090_v47 = vpack.c.bf16 %v793_v41, %v790_v38  ;;  %v4116_v49 = vsub.f32 %v767_v37, %v793_v41 }
  0xa7   :  { %v884_v13 = vsub.f32 %v4114_v44, %v883_v33  ;;  %v4194_v61 = vpack.c.bf16 %v934_v56, %v927_v36 }
  0xa8   :  { %3167 = vmatpush3.bf16.msra.mxu1 %v3166_v23  ;;  %3239 = vmatpush3.bf16.msra.mxu0 %v3930_v53  ;;  %v769_v53 = vld [vmem:[#allocation7 + $0x18] sm:$0xff]  ;;  %v890_v46 = vand.u32 4294901760, %v4116_v49  ;;  %v4681_v23 = vand.u32 4294901760, %v4120_v7  ;;  %v3292_v4 = vpack.c.bf16 %v4116_v49, %v4114_v44  ;;  %v4696_v44 = vand.u32 4294901760, %v4124_v9 }
  0xa9   :  { %3168 = vmatprep.subr.bf16.mxu1 %v3730_v0  ;;  %3240 = vmatprep.subr.bf16.mxu0 %v3730_v0  ;;  %v885_v32 = vand.u32 4294901760, %v884_v13  ;;  %v961_v13 = vsub.f32 %v4140_v24, %v4672_v14 }
  0xaa   :  { %v891_v18 = vsub.f32 %v4116_v49, %v890_v46  ;;  %v898_v38 = vsub.f32 %v4120_v7, %v4681_v23 }
  0xac   :  { %3170 = vmatpush3.bf16.msra.mxu1 %v3169_v31  ;;  %3242 = vmatpush3.bf16.msra.mxu0 %v3951_v63  ;;  %v771_v63 = vld [vmem:[#allocation7 + $0x28] sm:$0xff]  ;;  %v892_v37 = vand.u32 4294901760, %v891_v18  ;;  %v955_v18 = vand.u32 4294901760, %v954_v27 }
  0xad   :  { %3243 = vmatprep.subr.bf16.mxu1 %v3730_v0  ;;  %3387 = vmatprep.subr.bf16.mxu0 %v3730_v0  ;;  %v805_v6 = vand.u32 4294901760, %v771_v63 }
  0xaf   :  { %2572 = vmatmul.mubr.f32.vlgmr.msra.gmra.mrb[0].mxu1 %v3897_v40  ;;  %2677 = vmatmul.mubr.f32.vlgmr.msra.gmra.mrb[0].mxu0 %v3875_v30  ;;  %v799_v40 = vand.u32 4294901760, %v769_v53  ;;  %v4098_v19 = vpack.c.bf16 %v805_v6, %v802_v5  ;;  %v4126_v10 = vsub.f32 %v771_v63, %v805_v6  ;;  %v912_v63 = vsub.f32 %v4124_v9, %v4679_v48 }
  0xb0   :  { %2711 = vmatprep.mubr.msk.f32.mxu1 %vm3731_vm0, %v3732_v1  ;;  %2921 = vmatprep.mubr.msk.f32.mxu0 %vm3731_vm0, %v3732_v1 }
  0xb1   :  { %3245 = vmatpush3.bf16.msra.mxu1 %v4090_v47  ;;  %v4094_v30 = vpack.c.bf16 %v799_v40, %v796_v57  ;;  %v4122_v8 = vsub.f32 %v769_v53, %v799_v40  ;;  %v4678_v53 = vand.u32 4294901760, %v4126_v10  ;;  %v4172_v57 = vpack.c.bf16 %v892_v37, %v885_v32 }
  0xb2   :  { %3246 = vmatprep.subr.bf16.mxu1 %v3730_v0  ;;  %v899_v40 = vand.u32 4294901760, %v898_v38  ;;  %v913_v20 = vand.u32 4294901760, %v912_v63  ;;  %v962_v32 = vand.u32 4294901760, %v961_v13  ;;  %v4671_v37 = vand.u32 4294901760, %v4142_v25 }
  0xb3   :  { %v4680_v31 = vand.u32 4294901760, %v4122_v8  ;;  %v919_v5 = vsub.f32 %v4126_v10, %v4678_v53  ;;  %v4670_v38 = vand.u32 4294901760, %v4144_v26  ;;  %v3295_v43 = vpack.c.bf16 %v4122_v8, %v4120_v7 }
  0xb4   :  { %v3298_v27 = vpack.c.bf16 %v4126_v10, %v4124_v9  ;;  %v3301_v13 = vpack.c.bf16 %v4131_v16, %v4129_v15  ;;  %v4697_v49 = vand.u32 4294901760, %v4126_v10  ;;  %v4702_v9 = vand.u32 4294901760, %v4138_v22 }
  0xb5   :  { %3248 = vmatpush3.bf16.msra.mxu1 %v4094_v30  ;;  %v905_v41 = vsub.f32 %v4122_v8, %v4680_v31  ;;  %v920_v28 = vand.u32 4294901760, %v919_v5  ;;  %v4703_v10 = vand.u32 4294901760, %v4140_v24 }
  0xb6   :  { %3249 = vmatprep.subr.bf16.mxu1 %v3730_v0 }
  0xb7   :  { %v906_v58 = vand.u32 4294901760, %v905_v41  ;;  %v4184_v35 = vpack.c.bf16 %v920_v28, %v913_v20  ;;  %v4214_v41 = vpack.c.bf16 %v962_v32, %v955_v18  ;;  %v4669_v20 = vand.u32 4294901760, %v4150_v29 }
  0xb8   :  { %v4668_v28 = vand.u32 4294901760, %v4152_v12  ;;  %v3304_v18 = vpack.c.bf16 %v4135_v21, %v4133_v17  ;;  %v3307_v32 = vpack.c.bf16 %v4140_v24, %v4138_v22  ;;  %v1451_v24 = vld [vmem:[#allocation8 + $0x18] sm:$0xff] }
  0xb9   :  { %3251 = vmatpush3.bf16.msra.mxu1 %v4098_v19  ;;  %v4180_v6 = vpack.c.bf16 %v906_v58, %v899_v40  ;;  %v968_v40 = vsub.f32 %v4142_v25, %v4671_v37  ;;  %v975_v58 = vsub.f32 %v4144_v26, %v4670_v38  ;;  %v982_v55 = vsub.f32 %v4150_v29, %v4669_v20 }
  0xba   :  { %3252 = vmatprep.subr.bf16.mxu1 %v3730_v0  ;;  %v989_v36 = vsub.f32 %v4152_v12, %v4668_v28 }
  0xbb   :  { %v969_v63 = vand.u32 4294901760, %v968_v40  ;;  %v976_v5 = vand.u32 4294901760, %v975_v58  ;;  %v983_v56 = vand.u32 4294901760, %v982_v55  ;;  %v3310_v40 = vpack.c.bf16 %v4144_v26, %v4142_v25 }
  0xbc   :  { %v990_v2 = vand.u32 4294901760, %v989_v36  ;;  %v3313_v58 = vpack.c.bf16 %v4152_v12, %v4150_v29 }
  0xbd   :  { %3254 = vmatpush3.bf16.msra.mxu1 %v4102_v54  ;;  %v3286_v39 = vpack.c.bf16 %v976_v5, %v969_v63  ;;  %v2160_v63 = vld [vmem:[%s4661_s2] ss:$0 sm:$0xff] }
  0xbe   :  { %3255 = vmatprep.subr.bf16.mxu1 %v3730_v0  ;;  %v3289_v3 = vpack.c.bf16 %v990_v2, %v983_v56 }
  0xc1   :  { %3257 = vmatpush3.bf16.msra.mxu1 %v4106_v42 }
  0xc2   :  { %3258 = vmatprep.subr.bf16.mxu1 %v3730_v0 }
  0xc5   :  { %3260 = vmatpush3.bf16.msra.mxu1 %v4110_v62 }
  0xc6   :  { %3261 = vmatprep.subr.bf16.mxu1 %v3730_v0 }
  0xc9   :  { %3263 = vmatpush3.bf16.msra.mxu1 %v4118_v50 }
  0xca   :  { %3264 = vmatprep.subr.bf16.mxu1 %v3730_v0 }
  0xcd   :  { %3266 = vmatpush3.bf16.msra.mxu1 %v4148_v51 }
  0xce   :  { %3267 = vmatprep.subr.bf16.mxu1 %v3730_v0 }
 0x182   :  { %v449_v5 = vpop.f32.mrb[0].mxu1  ;;  %v744_v55 = vpop.f32.mrb[0].mxu0 }
 0x183   :  { %v3531_v36 = vadd.f32 %v2160_v63, %v449_v5  ;;  %v2573_v56 = vpop.f32.mrb[1].mxu1  ;;  %v2678_v2 = vpop.f32.mrb[1].mxu0 }
 0x184   :  { %v1461_v56 = vld [vmem:[#allocation8 + $0x68] sm:$0xff] }
 0x185   :  { %v3532_v28 = vadd.f32 %v3531_v36, %v744_v55 }
 0x187   :  { %v751_v20 = vand.u32 2147483647, %v3532_v28  ;;  %v748_v31 = vmax.f32 %v3532_v28, 0.0  ;;  %vm749_vm2 = vcmp.ne.f32.partialorder %v3532_v28, %v3532_v28 }
 0x189   :  { %v752_v38 = vsub.f32 0.0, %v751_v20 }
 0x18b   :  { %v753_v37 = vmul.f32 1.442695, %v752_v38 }
 0x18d   :  { %3574 = vpow2.f32 %v753_v37 }
 0x197   :  { %v3575_v14 = vpop.eup %3574 }
 0x198   :  { %v755_v11 = vadd.f32 1.0, %v3575_v14  ;;  %v758_v60 = vmul.f32 -0.5, %v3575_v14  ;;  %v761_v52 = vand.u32 2147483647, %v3575_v14 }
 0x19a   :  { %3576 = vlog2.f32 %v755_v11  ;;  %v759_v59 = vadd.f32 1.0, %v758_v60  ;;  %vm762_vm1 = vcmp.lt.f32.partialorder %v761_v52, 0.0004427343  ;;  %v3355_v52 = vpack.c.bf16 %v4703_v10, %v4702_v9  ;;  %v1455_v11 = vld [vmem:[#allocation8 + $0x38] sm:$0xff] }
 0x19c   :  { %v760_v48 = vmul.f32 %v3575_v14, %v759_v59 }
 0x1a4   :  { %v3577_v34 = vpop.eup %3576 }
 0x1a5   :  { %v757_v53 = vmul.f32 0.6931472, %v3577_v34 }
 0x1a7   :  { %v763_v23 = vsel %vm762_vm1, %v760_v48, %v757_v53  ;;  %v4695_v48 = vand.u32 4294901760, %v4122_v8 }
 0x1a8   :  { %v764_v63 = vadd.f32 %v763_v23, %v748_v31  ;;  %v3340_v23 = vpack.c.bf16 %v890_v46, %v883_v33  ;;  %v4694_v31 = vand.u32 4294901760, %v4120_v7  ;;  %v3346_v33 = vpack.c.bf16 %v4697_v49, %v4696_v44 }
 0x1a9   :  { %v4698_v46 = vand.u32 4294901760, %v4129_v15  ;;  %v4699_v7 = vand.u32 4294901760, %v4131_v16  ;;  %v4704_v15 = vand.u32 4294901760, %v4142_v25  ;;  %v4705_v16 = vand.u32 4294901760, %v4144_v26  ;;  %v1452_v26 = vld [vmem:[#allocation8 + $0x20] sm:$0xff] }
 0x1aa   :  { %v765_v5 = vsel %vm749_vm2, %v3532_v28, %v764_v63  ;;  %v3343_v53 = vpack.c.bf16 %v4695_v48, %v4694_v31  ;;  %v1481_v25 = vand.u32 4294901760, %v1451_v24  ;;  %v1456_v28 = vld [vmem:[#allocation8 + $0x40] sm:$0xff]  ;;  %v1511_v63 = vand.u32 4294901760, %v1461_v56  ;;  %v1462_v31 = vld [vmem:[#allocation8 + $0x70] sm:$0xff]  ;;  %v1463_v48 = vld [vmem:[#allocation8 + $0x78] sm:$0xff] }
 0x1ab   :  { %v4249_v55 = vand.u32 4294901760, %v765_v5  ;;  %v3349_v8 = vpack.c.bf16 %v4699_v7, %v4698_v46 }
 0x1ad   :  { %v871_v38 = vsub.f32 %v765_v5, %v4249_v55 }
 0x1af   :  { %v872_v37 = vand.u32 4294901760, %v871_v38 }
 0x1b1   :  { %v873_v20 = vsub.f32 %v871_v38, %v872_v37 }
 0x1b3   :  { %v874_v36 = vand.u32 4294901760, %v873_v20  ;;  %v4399_v20 = vsub.f32 %v1451_v24, %v1481_v25 }
 0x1b5   :  { %2712 = vmatmul.mubr.f32.vlgmr.msra.gmra.mrb[2].mxu1 %v874_v36 }
 0x1b6   :  { %3269 = vmatpush3.bf16.msra.mxu1 %v4172_v57  ;;  %2746 = vmatprep.mubr.msk.f32.mxu1 %vm3731_vm0, %v3732_v1  ;;  %v4700_v57 = vand.u32 4294901760, %v4133_v17  ;;  %v4706_v17 = vand.u32 4294901760, %v4150_v29  ;;  %v1484_v29 = vand.u32 4294901760, %v1452_v26 }
 0x1b7   :  { %3270 = vmatprep.subr.bf16.mxu1 %v3730_v0 }
 0x1b8   :  { %v4401_v36 = vsub.f32 %v1452_v26, %v1484_v29 }
 0x1ba   :  { %3272 = vmatpush3.bf16.msra.mxu1 %v4180_v6  ;;  %v4701_v6 = vand.u32 4294901760, %v4135_v21  ;;  %v4707_v21 = vand.u32 4294901760, %v4152_v12 }
 0x1bb   :  { %3273 = vmatprep.subr.bf16.mxu1 %v3730_v0 }
 0x1bc   :  { %v3352_v34 = vpack.c.bf16 %v4701_v6, %v4700_v57  ;;  %v3361_v59 = vpack.c.bf16 %v4707_v21, %v4706_v17  ;;  %v4421_v57 = vsub.f32 %v1461_v56, %v1511_v63  ;;  %v1514_v6 = vand.u32 4294901760, %v1462_v31 }
 0x1be   :  { %3275 = vmatpush3.bf16.msra.mxu1 %v4184_v35  ;;  %v3358_v35 = vpack.c.bf16 %v4705_v16, %v4704_v15  ;;  %v4427_v15 = vsub.f32 %v1462_v31, %v1514_v6 }
 0x1bf   :  { %3276 = vmatprep.subr.bf16.mxu1 %v3730_v0 }
 0x1c2   :  { %3278 = vmatpush3.bf16.msra.mxu1 %v4194_v61  ;;  %v1454_v61 = vld [vmem:[#allocation8 + $0x30] sm:$0xff] }
 0x1c3   :  { %3279 = vmatprep.subr.bf16.mxu1 %v3730_v0  ;;  %v1490_v14 = vand.u32 4294901760, %v1454_v61 }
 0x1c6   :  { %3281 = vmatpush3.bf16.msra.mxu1 %v4204_v45  ;;  %v1493_v45 = vand.u32 4294901760, %v1455_v11 }
 0x1c7   :  { %3282 = vmatprep.subr.bf16.mxu1 %v3730_v0 }
 0x1c8   :  { %v4408_v44 = vsub.f32 %v1455_v11, %v1493_v45 }
 0x1ca   :  { %3284 = vmatpush3.bf16.msra.mxu1 %v4214_v41  ;;  %v4379_v41 = vpack.c.bf16 %v1493_v45, %v1490_v14  ;;  %v4690_v45 = vand.u32 4294901760, %v4408_v44 }
 0x1cb   :  { %3285 = vmatprep.subr.bf16.mxu1 %v3730_v0 }
 0x1ce   :  { %3287 = vmatpush3.bf16.msra.mxu1 %v3286_v39  ;;  %v1457_v39 = vld [vmem:[#allocation8 + $0x48] sm:$0xff] }
 0x1cf   :  { %3288 = vmatprep.subr.bf16.mxu1 %v3730_v0 }
 0x1d2   :  { %3290 = vmatpush3.bf16.msra.mxu1 %v3289_v3  ;;  %v1496_v3 = vand.u32 4294901760, %v1456_v28 }
 0x1d3   :  { %3291 = vmatprep.subr.bf16.mxu1 %v3730_v0 }
 0x1d4   :  { %v4410_v49 = vsub.f32 %v1456_v28, %v1496_v3 }
 0x1d5   :  { %2747 = vmatmul.mubr.f32.vlgmr.msra.gmra.mrb[2].mxu1 %v4249_v55 }
 0x1d6   :  { %3293 = vmatpush3.bf16.msra.mxu1 %v3292_v4  ;;  %2781 = vmatprep.mubr.msk.f32.mxu1 %vm3731_vm0, %v3732_v1  ;;  %v1499_v4 = vand.u32 4294901760, %v1457_v39 }
 0x1d7   :  { %3294 = vmatprep.subr.bf16.mxu1 %v3730_v0 }
 0x1da   :  { %3296 = vmatpush3.bf16.msra.mxu1 %v3295_v43  ;;  %v4383_v43 = vpack.c.bf16 %v1499_v4, %v1496_v3  ;;  %v1615_v3 = vsub.f32 %v4408_v44, %v4690_v45 }
 0x1db   :  { %3297 = vmatprep.subr.bf16.mxu1 %v3730_v0 }
 0x1de   :  { %3299 = vmatpush3.bf16.msra.mxu1 %v3298_v27  ;;  %v1458_v27 = vld [vmem:[#allocation8 + $0x50] sm:$0xff] }
 0x1df   :  { %3300 = vmatprep.subr.bf16.mxu1 %v3730_v0 }
 0x1e2   :  { %3302 = vmatpush3.bf16.msra.mxu1 %v3301_v13  ;;  %v1459_v13 = vld [vmem:[#allocation8 + $0x58] sm:$0xff] }
 0x1e3   :  { %3303 = vmatprep.subr.bf16.mxu1 %v3730_v0 }
 0x1e6   :  { %3305 = vmatpush3.bf16.msra.mxu1 %v3304_v18  ;;  %v1502_v18 = vand.u32 4294901760, %v1458_v27 }
 0x1e7   :  { %3306 = vmatprep.subr.bf16.mxu1 %v3730_v0 }
 0x1e8   :  { %v4415_v46 = vsub.f32 %v1458_v27, %v1502_v18  ;;  %v1616_v27 = vand.u32 4294901760, %v1615_v3 }
 0x1ea   :  { %3308 = vmatpush3.bf16.msra.mxu1 %v3307_v32  ;;  %v1505_v32 = vand.u32 4294901760, %v1459_v13  ;;  %v4687_v31 = vand.u32 4294901760, %v4415_v46 }
 0x1eb   :  { %3309 = vmatprep.subr.bf16.mxu1 %v3730_v0 }
 0x1ec   :  { %v4417_v7 = vsub.f32 %v1459_v13, %v1505_v32  ;;  %v4689_v13 = vand.u32 4294901760, %v4410_v49 }
 0x1ee   :  { %3311 = vmatpush3.bf16.msra.mxu1 %v3310_v40  ;;  %v4387_v40 = vpack.c.bf16 %v1505_v32, %v1502_v18 }
 0x1ef   :  { %3312 = vmatprep.subr.bf16.mxu1 %v3730_v0 }
 0x1f2   :  { %3314 = vmatpush3.bf16.msra.mxu1 %v3313_v58  ;;  %v1460_v58 = vld [vmem:[#allocation8 + $0x60] sm:$0xff] }
 0x1f3   :  { %3315 = vmatprep.subr.bf16.mxu1 %v3730_v0  ;;  %v1508_v2 = vand.u32 4294901760, %v1460_v58 }
 0x1f5   :  { %2782 = vmatmul.mubr.f32.vlgmr.msra.gmra.mrb[2].mxu1 %v871_v38  ;;  %v4395_v38 = vpack.c.bf16 %v1511_v63, %v1508_v2 }
 0x1f6   :  { %3317 = vmatpush3.bf16.msra.mxu1 %v4090_v47  ;;  %2816 = vmatprep.mubr.msk.f32.mxu1 %vm3731_vm0, %v3732_v1 }
 0x1f7   :  { %3318 = vmatprep.subr.bf16.mxu1 %v3730_v0 }
 0x1fa   :  { %3320 = vmatpush3.bf16.msra.mxu1 %v4094_v30 }
 0x1fb   :  { %3321 = vmatprep.subr.bf16.mxu1 %v3730_v0 }
 0x1fe   :  { %3323 = vmatpush3.bf16.msra.mxu1 %v4098_v19 }
 0x1ff   :  { %3324 = vmatprep.subr.bf16.mxu1 %v3730_v0 }
 0x202   :  { %3326 = vmatpush3.bf16.msra.mxu1 %v4102_v54 }
 0x203   :  { %3327 = vmatprep.subr.bf16.mxu1 %v3730_v0 }
 0x206   :  { %3329 = vmatpush3.bf16.msra.mxu1 %v4106_v42 }
 0x207   :  { %3330 = vmatprep.subr.bf16.mxu1 %v3730_v0 }
 0x20a   :  { %3332 = vmatpush3.bf16.msra.mxu1 %v4110_v62 }
 0x20b   :  { %3333 = vmatprep.subr.bf16.mxu1 %v3730_v0 }
 0x20e   :  { %3335 = vmatpush3.bf16.msra.mxu1 %v4118_v50 }
 0x20f   :  { %3336 = vmatprep.subr.bf16.mxu1 %v3730_v0 }
 0x212   :  { %3338 = vmatpush3.bf16.msra.mxu1 %v4148_v51 }
 0x213   :  { %3339 = vmatprep.subr.bf16.mxu1 %v3730_v0 }
 0x215   :  { %2817 = vmatmul.mubr.f32.vlgmr.msra.gmra.mrb[2].mxu1 %v872_v37 }
 0x216   :  { %3341 = vmatpush3.bf16.msra.mxu1 %v3340_v23  ;;  %2851 = vmatprep.mubr.msk.f32.mxu1 %vm3731_vm0, %v3732_v1 }
 0x217   :  { %3342 = vmatprep.subr.bf16.mxu1 %v3730_v0 }
 0x21a   :  { %3344 = vmatpush3.bf16.msra.mxu1 %v3343_v53  ;;  %v4406_v53 = vsub.f32 %v1454_v61, %v1490_v14 }
 0x21b   :  { %3345 = vmatprep.subr.bf16.mxu1 %v3730_v0 }
 0x21c   :  { %v4691_v14 = vand.u32 4294901760, %v4406_v53 }
 0x21e   :  { %3347 = vmatpush3.bf16.msra.mxu1 %v3346_v33  ;;  %v4412_v33 = vsub.f32 %v1457_v39, %v1499_v4  ;;  %v1608_v39 = vsub.f32 %v4406_v53, %v4691_v14 }
 0x21f   :  { %3348 = vmatprep.subr.bf16.mxu1 %v3730_v0 }
 0x220   :  { %v1609_v4 = vand.u32 4294901760, %v1608_v39  ;;  %v4688_v18 = vand.u32 4294901760, %v4412_v33 }
 0x222   :  { %3350 = vmatpush3.bf16.msra.mxu1 %v3349_v8  ;;  %v4419_v8 = vsub.f32 %v1460_v58, %v1508_v2  ;;  %v4471_v32 = vpack.c.bf16 %v1616_v27, %v1609_v4  ;;  %v1622_v58 = vsub.f32 %v4410_v49, %v4689_v13  ;;  %v1629_v56 = vsub.f32 %v4412_v33, %v4688_v18 }
 0x223   :  { %3351 = vmatprep.subr.bf16.mxu1 %v3730_v0 }
 0x224   :  { %v1623_v2 = vand.u32 4294901760, %v1622_v58  ;;  %v1630_v63 = vand.u32 4294901760, %v1629_v56 }
 0x226   :  { %3353 = vmatpush3.bf16.msra.mxu1 %v3352_v34  ;;  %v1517_v34 = vand.u32 4294901760, %v1463_v48 }
 0x227   :  { %3354 = vmatprep.subr.bf16.mxu1 %v3730_v0 }
 0x228   :  { %v4429_v16 = vsub.f32 %v1463_v48, %v1517_v34  ;;  %v4686_v48 = vand.u32 4294901760, %v4417_v7 }
 0x22a   :  { %3356 = vmatpush3.bf16.msra.mxu1 %v3355_v52  ;;  %v4425_v52 = vpack.c.bf16 %v1517_v34, %v1514_v6  ;;  %v4481_v6 = vpack.c.bf16 %v1630_v63, %v1623_v2  ;;  %v1636_v34 = vsub.f32 %v4415_v46, %v4687_v31 }
 0x22b   :  { %3357 = vmatprep.subr.bf16.mxu1 %v3730_v0 }
 0x22e   :  { %3359 = vmatpush3.bf16.msra.mxu1 %v3358_v35 }
 0x22f   :  { %3360 = vmatprep.subr.bf16.mxu1 %v3730_v0 }
 0x232   :  { %3362 = vmatpush3.bf16.msra.mxu1 %v3361_v59  ;;  %v1586_v59 = vand.u32 4294901760, %v4399_v20 }
 0x233   :  { %3363 = vmatprep.subr.bf16.mxu1 %v3730_v0 }
 0x235   :  { %2852 = vmatmul.mubr.f32.vlgmr.msra.gmra.mrb[2].mxu1 %v4249_v55 }
 0x236   :  { %3365 = vmatpush3.bf16.msra.mxu1 %v4090_v47  ;;  %2886 = vmatprep.mubr.msk.f32.mxu1 %vm3731_vm0, %v3732_v1  ;;  %v1448_v47 = vld [vmem:[#allocation8] sm:$0xff] }
 0x237   :  { %3366 = vmatprep.subr.bf16.mxu1 %v3730_v0 }
 0x23a   :  { %3368 = vmatpush3.bf16.msra.mxu1 %v4094_v30  ;;  %v1449_v30 = vld [vmem:[#allocation8 + $0x8] sm:$0xff] }
 0x23b   :  { %3369 = vmatprep.subr.bf16.mxu1 %v3730_v0 }
 0x23e   :  { %3371 = vmatpush3.bf16.msra.mxu1 %v4098_v19  ;;  %v1472_v19 = vand.u32 4294901760, %v1448_v47 }
 0x23f   :  { %3372 = vmatprep.subr.bf16.mxu1 %v3730_v0 }
 0x240   :  { %v4391_v5 = vsub.f32 %v1448_v47, %v1472_v19 }
 0x242   :  { %3374 = vmatpush3.bf16.msra.mxu1 %v4102_v54  ;;  %v1475_v54 = vand.u32 4294901760, %v1449_v30  ;;  %v1565_v9 = vand.u32 4294901760, %v4391_v5 }
 0x243   :  { %3375 = vmatprep.subr.bf16.mxu1 %v3730_v0 }
 0x244   :  { %v4367_v22 = vpack.c.bf16 %v1475_v54, %v1472_v19  ;;  %v1566_v35 = vsub.f32 %v4391_v5, %v1565_v9 }
 0x246   :  { %3377 = vmatpush3.bf16.msra.mxu1 %v4106_v42  ;;  %v1450_v42 = vld [vmem:[#allocation8 + $0x10] sm:$0xff]  ;;  %3389 = vmatpush3.bf16.msra.mxu0 %v4367_v22  ;;  %v1567_v47 = vand.u32 4294901760, %v1566_v35  ;;  %v1643_v35 = vsub.f32 %v4417_v7, %v4686_v48 }
 0x247   :  { %3378 = vmatprep.subr.bf16.mxu1 %v3730_v0  ;;  %3390 = vmatprep.subr.bf16.mxu0 %v3730_v0 }
 0x24a   :  { %3380 = vmatpush3.bf16.msra.mxu1 %v4110_v62  ;;  %v1478_v62 = vand.u32 4294901760, %v1450_v42 }
 0x24b   :  { %3381 = vmatprep.subr.bf16.mxu1 %v3730_v0 }
 0x24c   :  { %v4397_v37 = vsub.f32 %v1450_v42, %v1478_v62  ;;  %v4693_v42 = vand.u32 4294901760, %v4401_v36 }
 0x24e   :  { %3383 = vmatpush3.bf16.msra.mxu1 %v4118_v50  ;;  %v4371_v50 = vpack.c.bf16 %v1481_v25, %v1478_v62  ;;  %v1579_v21 = vand.u32 4294901760, %v4397_v37  ;;  %v3439_v63 = vpack.c.bf16 %v4399_v20, %v4397_v37 }
 0x24f   :  { %3384 = vmatprep.subr.bf16.mxu1 %v3730_v0 }
 0x250   :  { %3392 = vmatpush3.bf16.msra.mxu0 %v4371_v50  ;;  %v1580_v19 = vsub.f32 %v4397_v37, %v1579_v21  ;;  %v4711_v37 = vand.u32 4294901760, %v4408_v44 }
 0x251   :  { %3393 = vmatprep.subr.bf16.mxu0 %v3730_v0 }
 0x252   :  { %3386 = vmatpush3.bf16.msra.mxu1 %v4148_v51  ;;  %v1453_v51 = vld [vmem:[#allocation8 + $0x28] sm:$0xff]  ;;  %v1581_v25 = vand.u32 4294901760, %v1580_v19  ;;  %v4684_v19 = vand.u32 4294901760, %v4421_v57 }
 0x253   :  { %v1487_v12 = vand.u32 4294901760, %v1453_v51 }
 0x255   :  { %2887 = vmatmul.mubr.f32.vlgmr.msra.gmra.mrb[2].mxu1 %v4249_v55  ;;  %v4375_v60 = vpack.c.bf16 %v1487_v12, %v1484_v29  ;;  %v4393_v55 = vsub.f32 %v1449_v30, %v1475_v54  ;;  %v4403_v23 = vsub.f32 %v1453_v51, %v1487_v12  ;;  %v1587_v54 = vsub.f32 %v4399_v20, %v1586_v59 }
 0x256   :  { %v1594_v51 = vsub.f32 %v4401_v36, %v4693_v42 }
 0x257   :  { %3395 = vmatpush3.bf16.msra.mxu0 %v4375_v60  ;;  %v1572_v10 = vand.u32 4294901760, %v4393_v55  ;;  %v4692_v24 = vand.u32 4294901760, %v4403_v23  ;;  %v1588_v26 = vand.u32 4294901760, %v1587_v54  ;;  %v3436_v2 = vpack.c.bf16 %v4393_v55, %v4391_v5 }
 0x258   :  { %3396 = vmatprep.subr.bf16.mxu0 %v3730_v0  ;;  %v1595_v61 = vand.u32 4294901760, %v1594_v51  ;;  %v4708_v5 = vand.u32 4294901760, %v4401_v36 }
 0x259   :  { %v1573_v17 = vsub.f32 %v4393_v55, %v1572_v10  ;;  %v1601_v29 = vsub.f32 %v4403_v23, %v4692_v24  ;;  %v4457_v12 = vpack.c.bf16 %v1588_v26, %v1581_v25  ;;  %v1657_v26 = vsub.f32 %v4421_v57, %v4684_v19 }
 0x25a   :  { %v4709_v55 = vand.u32 4294901760, %v4403_v23 }
 0x25b   :  { %3398 = vmatpush3.bf16.msra.mxu0 %v4379_v41  ;;  %v1574_v30 = vand.u32 4294901760, %v1573_v17  ;;  %v1602_v11 = vand.u32 4294901760, %v1601_v29  ;;  %v1637_v17 = vand.u32 4294901760, %v1636_v34  ;;  %v1658_v29 = vand.u32 4294901760, %v1657_v26 }
 0x25c   :  { %3399 = vmatprep.subr.bf16.mxu0 %v3730_v0  ;;  %v3442_v34 = vpack.c.bf16 %v4403_v23, %v4401_v36  ;;  %v3457_v26 = vpack.c.bf16 %v4429_v16, %v4427_v15  ;;  %v4714_v36 = vand.u32 4294901760, %v4415_v46  ;;  %v4715_v23 = vand.u32 4294901760, %v4417_v7 }
 0x25d   :  { %v4449_v62 = vpack.c.bf16 %v1574_v30, %v1567_v47  ;;  %v4461_v28 = vpack.c.bf16 %v1602_v11, %v1595_v61  ;;  %v1644_v47 = vand.u32 4294901760, %v1643_v35  ;;  %v4685_v30 = vand.u32 4294901760, %v4419_v8 }
 0x25e   :  { %v4683_v61 = vand.u32 4294901760, %v4427_v15  ;;  %v4682_v11 = vand.u32 4294901760, %v4429_v16  ;;  %v3445_v35 = vpack.c.bf16 %v4408_v44, %v4406_v53  ;;  %v4717_v44 = vand.u32 4294901760, %v4421_v57 }
 0x25f   :  { %3401 = vmatpush3.bf16.msra.mxu0 %v4383_v43  ;;  %v3427_v54 = vpack.c.bf16 %v1644_v47, %v1637_v17  ;;  %v1650_v25 = vsub.f32 %v4419_v8, %v4685_v30  ;;  %v3448_v17 = vpack.c.bf16 %v4412_v33, %v4410_v49  ;;  %v3451_v47 = vpack.c.bf16 %v4417_v7, %v4415_v46 }
 0x260   :  { %3402 = vmatprep.subr.bf16.mxu0 %v3730_v0  ;;  %v1664_v3 = vsub.f32 %v4427_v15, %v4683_v61  ;;  %v1671_v4 = vsub.f32 %v4429_v16, %v4682_v11 }
 0x261   :  { %v1651_v51 = vand.u32 4294901760, %v1650_v25  ;;  %v3454_v25 = vpack.c.bf16 %v4421_v57, %v4419_v8 }
 0x262   :  { %v1665_v27 = vand.u32 4294901760, %v1664_v3  ;;  %v1672_v58 = vand.u32 4294901760, %v1671_v4 }
 0x263   :  { %3404 = vmatpush3.bf16.msra.mxu0 %v4387_v40  ;;  %v3430_v39 = vpack.c.bf16 %v1658_v29, %v1651_v51  ;;  %v2161_v51 = vld [vmem:[%s4663_s4] ss:$0 sm:$0xff] }
 0x264   :  { %3405 = vmatprep.subr.bf16.mxu0 %v3730_v0  ;;  %v3433_v56 = vpack.c.bf16 %v1672_v58, %v1665_v27 }
 0x267   :  { %3407 = vmatpush3.bf16.msra.mxu0 %v4395_v38 }
 0x268   :  { %3408 = vmatprep.subr.bf16.mxu0 %v3730_v0 }
 0x26b   :  { %3410 = vmatpush3.bf16.msra.mxu0 %v4425_v52 }
 0x26c   :  { %3411 = vmatprep.subr.bf16.mxu0 %v3730_v0 }
 0x328   :  { %v1426_v29 = vpop.f32.mrb[2].mxu1 }
 0x329   :  { %v3533_v3 = vadd.f32 %v2161_v51, %v1426_v29  ;;  %v2888_v4 = vpop.f32.mrb[3].mxu1 }
 0x32b   :  { %v1433_v27 = vand.u32 2147483647, %v3533_v3  ;;  %v1430_v14 = vmax.f32 %v3533_v3, 0.0  ;;  %vm1431_vm4 = vcmp.ne.f32.partialorder %v3533_v3, %v3533_v3 }
 0x32d   :  { %v1434_v58 = vsub.f32 0.0, %v1433_v27 }
 0x32f   :  { %v1435_v11 = vmul.f32 1.442695, %v1434_v58 }
 0x331   :  { %3578 = vpow2.f32 %v1435_v11 }
 0x33b   :  { %v3579_v61 = vpop.eup %3578 }
 0x33c   :  { %v1437_v19 = vadd.f32 1.0, %v3579_v61  ;;  %v1440_v30 = vmul.f32 -0.5, %v3579_v61  ;;  %v1443_v31 = vand.u32 2147483647, %v3579_v61 }
 0x33e   :  { %3580 = vlog2.f32 %v1437_v19  ;;  %v1441_v48 = vadd.f32 1.0, %v1440_v30  ;;  %vm1444_vm3 = vcmp.lt.f32.partialorder %v1443_v31, 0.0004427343 }
 0x340   :  { %v1442_v45 = vmul.f32 %v3579_v61, %v1441_v48 }
 0x348   :  { %v3581_v18 = vpop.eup %3580 }
 0x349   :  { %v1439_v13 = vmul.f32 0.6931472, %v3581_v18 }
 0x34b   :  { %v1445_v24 = vsel %vm1444_vm3, %v1442_v45, %v1439_v13 }
 0x34c   :  { %v1446_v42 = vadd.f32 %v1445_v24, %v1430_v14  ;;  %v3487_v24 = vpack.c.bf16 %v1586_v59, %v1579_v21  ;;  %v4712_v21 = vand.u32 4294901760, %v4410_v49  ;;  %v4713_v59 = vand.u32 4294901760, %v4412_v33 }
 0x34d   :  { %v4718_v49 = vand.u32 4294901760, %v4427_v15  ;;  %v4719_v33 = vand.u32 4294901760, %v4429_v16 }
 0x34e   :  { %v1447_v51 = vsel %vm1431_vm4, %v3533_v3, %v1446_v42  ;;  %v3484_v42 = vpack.c.bf16 %v1572_v10, %v1565_v9  ;;  %v3490_v9 = vpack.c.bf16 %v4709_v55, %v4708_v5  ;;  %v4710_v10 = vand.u32 4294901760, %v4406_v53 }
 0x34f   :  { %v4524_v29 = vand.u32 4294901760, %v1447_v51  ;;  %v4716_v53 = vand.u32 4294901760, %v4419_v8  ;;  %v3505_v45 = vpack.c.bf16 %v4719_v33, %v4718_v49 }
 0x350   :  { %v3493_v20 = vpack.c.bf16 %v4711_v37, %v4710_v10 }
 0x351   :  { %v1553_v4 = vsub.f32 %v1447_v51, %v4524_v29  ;;  %v3502_v14 = vpack.c.bf16 %v4717_v44, %v4716_v53 }
 0x353   :  { %v1554_v11 = vand.u32 4294901760, %v1553_v4 }
 0x355   :  { %v1555_v27 = vsub.f32 %v1553_v4, %v1554_v11 }
 0x357   :  { %v1556_v58 = vand.u32 4294901760, %v1555_v27 }
 0x359   :  { %2922 = vmatmul.mubr.f32.vlgmr.msra.gmra.mrb[2].mxu0 %v1556_v58 }
 0x35a   :  { %3413 = vmatpush3.bf16.msra.mxu0 %v4449_v62  ;;  %2956 = vmatprep.mubr.msk.f32.mxu0 %vm3731_vm0, %v3732_v1  ;;  %v3496_v62 = vpack.c.bf16 %v4713_v59, %v4712_v21 }
 0x35b   :  { %3414 = vmatprep.subr.bf16.mxu0 %v3730_v0 }
 0x35e   :  { %3416 = vmatpush3.bf16.msra.mxu0 %v4457_v12  ;;  %v3499_v12 = vpack.c.bf16 %v4715_v23, %v4714_v36 }
 0x35f   :  { %3417 = vmatprep.subr.bf16.mxu0 %v3730_v0 }
 0x362   :  { %3419 = vmatpush3.bf16.msra.mxu0 %v4461_v28 }
 0x363   :  { %3420 = vmatprep.subr.bf16.mxu0 %v3730_v0 }
 0x366   :  { %3422 = vmatpush3.bf16.msra.mxu0 %v4471_v32 }
 0x367   :  { %3423 = vmatprep.subr.bf16.mxu0 %v3730_v0 }
 0x36a   :  { %3425 = vmatpush3.bf16.msra.mxu0 %v4481_v6 }
 0x36b   :  { %3426 = vmatprep.subr.bf16.mxu0 %v3730_v0 }
 0x36e   :  { %3428 = vmatpush3.bf16.msra.mxu0 %v3427_v54 }
 0x36f   :  { %3429 = vmatprep.subr.bf16.mxu0 %v3730_v0 }
 0x372   :  { %3431 = vmatpush3.bf16.msra.mxu0 %v3430_v39 }
 0x373   :  { %3432 = vmatprep.subr.bf16.mxu0 %v3730_v0 }
 0x376   :  { %3434 = vmatpush3.bf16.msra.mxu0 %v3433_v56 }
 0x377   :  { %3435 = vmatprep.subr.bf16.mxu0 %v3730_v0 }
 0x379   :  { %2957 = vmatmul.mubr.f32.vlgmr.msra.gmra.mrb[2].mxu0 %v4524_v29 }
 0x37a   :  { %3437 = vmatpush3.bf16.msra.mxu0 %v3436_v2  ;;  %2991 = vmatprep.mubr.msk.f32.mxu0 %vm3731_vm0, %v3732_v1 }
 0x37b   :  { %3438 = vmatprep.subr.bf16.mxu0 %v3730_v0 }
 0x37e   :  { %3440 = vmatpush3.bf16.msra.mxu0 %v3439_v63 }
 0x37f   :  { %3441 = vmatprep.subr.bf16.mxu0 %v3730_v0 }
 0x382   :  { %3443 = vmatpush3.bf16.msra.mxu0 %v3442_v34 }
 0x383   :  { %3444 = vmatprep.subr.bf16.mxu0 %v3730_v0 }
 0x386   :  { %3446 = vmatpush3.bf16.msra.mxu0 %v3445_v35 }
 0x387   :  { %3447 = vmatprep.subr.bf16.mxu0 %v3730_v0 }
 0x38a   :  { %3449 = vmatpush3.bf16.msra.mxu0 %v3448_v17 }
 0x38b   :  { %3450 = vmatprep.subr.bf16.mxu0 %v3730_v0 }
 0x38e   :  { %3452 = vmatpush3.bf16.msra.mxu0 %v3451_v47 }
 0x38f   :  { %3453 = vmatprep.subr.bf16.mxu0 %v3730_v0 }
 0x392   :  { %3455 = vmatpush3.bf16.msra.mxu0 %v3454_v25 }
 0x393   :  { %3456 = vmatprep.subr.bf16.mxu0 %v3730_v0 }
 0x396   :  { %3458 = vmatpush3.bf16.msra.mxu0 %v3457_v26 }
 0x397   :  { %3459 = vmatprep.subr.bf16.mxu0 %v3730_v0 }
 0x399   :  { %2992 = vmatmul.mubr.f32.vlgmr.msra.gmra.mrb[2].mxu0 %v1553_v4 }
 0x39a   :  { %3461 = vmatpush3.bf16.msra.mxu0 %v4367_v22  ;;  %3026 = vmatprep.mubr.msk.f32.mxu0 %vm3731_vm0, %v3732_v1 }
 0x39b   :  { %3462 = vmatprep.subr.bf16.mxu0 %v3730_v0 }
 0x39e   :  { %3464 = vmatpush3.bf16.msra.mxu0 %v4371_v50 }
 0x39f   :  { %3465 = vmatprep.subr.bf16.mxu0 %v3730_v0 }
 0x3a2   :  { %3467 = vmatpush3.bf16.msra.mxu0 %v4375_v60 }
 0x3a3   :  { %3468 = vmatprep.subr.bf16.mxu0 %v3730_v0 }
 0x3a6   :  { %3470 = vmatpush3.bf16.msra.mxu0 %v4379_v41 }
 0x3a7   :  { %3471 = vmatprep.subr.bf16.mxu0 %v3730_v0 }
 0x3aa   :  { %3473 = vmatpush3.bf16.msra.mxu0 %v4383_v43 }
 0x3ab   :  { %3474 = vmatprep.subr.bf16.mxu0 %v3730_v0 }
 0x3ae   :  { %3476 = vmatpush3.bf16.msra.mxu0 %v4387_v40 }
 0x3af   :  { %3477 = vmatprep.subr.bf16.mxu0 %v3730_v0 }
 0x3b2   :  { %3479 = vmatpush3.bf16.msra.mxu0 %v4395_v38 }
 0x3b3   :  { %3480 = vmatprep.subr.bf16.mxu0 %v3730_v0 }
 0x3b6   :  { %3482 = vmatpush3.bf16.msra.mxu0 %v4425_v52 }
 0x3b7   :  { %3483 = vmatprep.subr.bf16.mxu0 %v3730_v0 }
 0x3b9   :  { %3027 = vmatmul.mubr.f32.vlgmr.msra.gmra.mrb[2].mxu0 %v1554_v11 }
 0x3ba   :  { %3485 = vmatpush3.bf16.msra.mxu0 %v3484_v42  ;;  %3061 = vmatprep.mubr.msk.f32.mxu0 %vm3731_vm0, %v3732_v1 }
 0x3bb   :  { %3486 = vmatprep.subr.bf16.mxu0 %v3730_v0 }
 0x3be   :  { %3488 = vmatpush3.bf16.msra.mxu0 %v3487_v24 }
 0x3bf   :  { %3489 = vmatprep.subr.bf16.mxu0 %v3730_v0 }
 0x3c2   :  { %3491 = vmatpush3.bf16.msra.mxu0 %v3490_v9 }
 0x3c3   :  { %3492 = vmatprep.subr.bf16.mxu0 %v3730_v0 }
 0x3c6   :  { %3494 = vmatpush3.bf16.msra.mxu0 %v3493_v20 }
 0x3c7   :  { %3495 = vmatprep.subr.bf16.mxu0 %v3730_v0 }
 0x3ca   :  { %3497 = vmatpush3.bf16.msra.mxu0 %v3496_v62 }
 0x3cb   :  { %3498 = vmatprep.subr.bf16.mxu0 %v3730_v0 }
 0x3ce   :  { %3500 = vmatpush3.bf16.msra.mxu0 %v3499_v12 }
 0x3cf   :  { %3501 = vmatprep.subr.bf16.mxu0 %v3730_v0 }
 0x3d2   :  { %3503 = vmatpush3.bf16.msra.mxu0 %v3502_v14 }
 0x3d3   :  { %3504 = vmatprep.subr.bf16.mxu0 %v3730_v0 }
 0x3d6   :  { %3506 = vmatpush3.bf16.msra.mxu0 %v3505_v45 }
 0x3d7   :  { %3507 = vmatprep.subr.bf16.mxu0 %v3730_v0 }
 0x3d9   :  { %3062 = vmatmul.mubr.f32.vlgmr.msra.gmra.mrb[2].mxu0 %v4524_v29 }
 0x3da   :  { %3509 = vmatpush3.bf16.msra.mxu0 %v4367_v22  ;;  %3096 = vmatprep.mubr.msk.f32.mxu0 %vm3731_vm0, %v3732_v1  ;;  %v2162_v1 = vld [vmem:[%s4665_s6] ss:$0 sm:$0xff] }
 0x3db   :  { %3510 = vmatprep.subr.bf16.mxu0 %v3730_v0 }
 0x3de   :  { %3512 = vmatpush3.bf16.msra.mxu0 %v4371_v50 }
 0x3df   :  { %3513 = vmatprep.subr.bf16.mxu0 %v3730_v0 }
 0x3e2   :  { %3515 = vmatpush3.bf16.msra.mxu0 %v4375_v60 }
 0x3e3   :  { %3516 = vmatprep.subr.bf16.mxu0 %v3730_v0 }
 0x3e6   :  { %3518 = vmatpush3.bf16.msra.mxu0 %v4379_v41 }
 0x3e7   :  { %3519 = vmatprep.subr.bf16.mxu0 %v3730_v0 }
 0x3ea   :  { %3521 = vmatpush3.bf16.msra.mxu0 %v4383_v43 }
 0x3eb   :  { %3522 = vmatprep.subr.bf16.mxu0 %v3730_v0 }
 0x3ee   :  { %3524 = vmatpush3.bf16.msra.mxu0 %v4387_v40 }
 0x3ef   :  { %3525 = vmatprep.subr.bf16.mxu0 %v3730_v0 }
 0x3f2   :  { %3527 = vmatpush3.bf16.msra.mxu0 %v4395_v38 }
 0x3f3   :  { %3528 = vmatprep.subr.bf16.mxu0 %v3730_v0 }
 0x3f6   :  { %3530 = vmatpush3.bf16.msra.mxu0 %v4425_v52 }
 0x3f9   :  { %3097 = vmatmul.mubr.f32.vlgmr.msra.gmra.mrb[2].mxu0 %v4524_v29 }
 0x4cc   :  { %v2108_v22 = vpop.f32.mrb[2].mxu0 }
 0x4cd   :  { %v3534_v50 = vadd.f32 %v2162_v1, %v2108_v22  ;;  %v3098_v60 = vpop.f32.mrb[3].mxu0 }
 0x4cf   :  { %v2113_v41 = vrot.slane %v3534_v50, 4  ;;  %v2119_v43 = vmul.f32 %v3534_v50, %v3534_v50  ;;  %2112 = vst [vmem:[#allocation10] sm:$0xff] %v3534_v50 }
 0x4d0   :  { %3681 = shalt.err (!%p3678_p8)
}
 0x4d1   :  { %s3682_s6 = scalar_lea.hbm %s4666_s7, 128 }
 0x4d2   :  { %p3683_p9 = scmp.ne.s32.totalorder %s4666_s7, %s3682_s6  ;;  %p3686_p10 = scmp.lt.u32.totalorder %s3682_s6, %s4666_s7 }
 0x4d4   :  { %p3688_p11 = pnand %p3686_p10, %p3683_p9 }
 0x4d6   :  { %3691 = shalt.err (!%p3688_p11)
}
 0x4d7   :  { %2138 = dma.vmem_to_hbm [thread:$0]  %s2136_s11, 128, %s4666_s7, [#allocation4]   ;;  %v2114_v0 = vadd.f32 %v3534_v50, %v2113_v41  ;;  %v2120_v40 = vrot.slane %v2119_v43, 4  ;;  %vm2126_vm5 = vcmask 1040384  }
 0x4d8   :  { %s3734_s23 = smov [#allocation11]  }
 0x4d9   :  { %v2115_v38 = vrot.slane %v2114_v0, 2  ;;  %v2121_v46 = vadd.f32 %v2120_v40, %v2119_v43  ;;  %s2145_s24 = sshll.u32 %s3734_s23, 4  ;;  %s2146_s24 = int_to_ptr.vmem [resolvable:$true] %s2145_s24 }
 0x4da   :  { %s3692_s25 = scalar_lea.vmem %s2146_s24, 32  ;;  %p3697_p13 = scmp.lt.s32.totalorder %s2146_s24, %s2146_s24 }
 0x4db   :  { %v2116_v7 = vadd.f32 %v2115_v38, %v2114_v0  ;;  %v2122_v8 = vrot.slane %v2121_v46, 2  ;;  %p3693_p12 = scmp.ne.s32.totalorder %s2146_s24, %s3692_s25  ;;  %p3698_p0 = scmp.lt.s32.totalorder %s3692_s25, %s3692_s25 }
 0x4dd   :  { %v2117_v57 = vrot.slane %v2116_v7, 1  ;;  %v2123_v52 = vadd.f32 %v2122_v8, %v2121_v46  ;;  %p3699_p1 = por %p3698_p0, %p3697_p13 }
 0x4df   :  { %v2124_v15 = vrot.slane %v2123_v52, 1  ;;  %v2118_v16 = vadd.f32 %v2117_v57, %v2116_v7  ;;  %p3700_p2 = pnand %p3699_p1, %p3693_p12 }
 0x4e1   :  { %v2125_v28 = vadd.f32 %v2124_v15, %v2123_v52 }
 0x4e3   :  { %v2127_v13 = vsel %vm2126_vm5, %v2118_v16, %v2125_v28 }
 0x4e4   :  { %2128 = vst [vmem:[#allocation11] sm:$0x3] %v2127_v13 }
 0x4e5   :  { %3703 = shalt.err (!%p3700_p2)
}
 0x4e6   :  { %s3704_s27 = scalar_lea.hbm %s4667_s8, 32 }
 0x4e7   :  { %p3705_p3 = scmp.ne.s32.totalorder %s4667_s8, %s3704_s27  ;;  %p3708_p4 = scmp.lt.u32.totalorder %s3704_s27, %s4667_s8 }
 0x4e9   :  { %p3710_p5 = pnand %p3708_p4, %p3705_p3 }
 0x4eb   :  { %3713 = shalt.err (!%p3710_p5)
}
 0x4ec   :  { %2148 = dma.vmem_to_hbm [thread:$0]  %s2146_s24, 32, %s4667_s8, [#allocation12]  }
 0x4ed   :  { %3720 = dma.done.wait [#allocation4], 128  }
 0x4ee   :  { %3721 = vsyncadd [#allocation4], 4294967168 }
 0x4ef   :  { %3722 = dma.done.wait [#allocation12], 32  }
 0x4f0   :  { %3723 = vsyncadd [#allocation12], 4294967264 }
 0x4f1   :  { %2155 = vsyncpa [#allocation3], 1 }
 0x4f2   :  { %2156 = vsyncpa [#allocation6], 1 }
 0x4f3   :  { %2157 = vsyncpa [#allocation9], 1 }
 0x4f4   :  { %2158 = vsyncpa [#allocation4], 1 }
 0x4f5   :  { %2159 = vsyncpa [#allocation12], 1 }

</bundles_post_ra>
